<compile_context>
chip_gen: v7x
topology: tpu7x:2x2x1
jax: 0.10.0
libtpu: 0.0.40
codegen_flags: <defaults>
</compile_context>

<pallas_src>
import functools

import jax
import jax.numpy as jnp
from jax.experimental import pallas as pl
from jax.experimental.pallas import tpu as pltpu


def _round_up(x, m):
    return (x + m - 1) // m * m


# ------------------------------ fused kernel --------------------------------

def _make_fused_kernel(input_size, layer_dims, hdec, htd, out_pad):
    """Fused TiDE forward.

    layer_dims: tuple of (d_in, hidden, d_out) per encoder/decoder layer.
    hdec = h * decoder_output_dim, htd = h * temporal_decoder_dim.
    """
    n_layers = len(layer_dims)

    def kernel(*refs):
        x_ref, gs_ref = refs[0], refs[1]
        layer_refs = refs[2:2 + n_layers]
        ta_ref = refs[2 + n_layers]
        tb_ref = refs[3 + n_layers]
        o_ref = refs[4 + n_layers]

        x = x_ref[...]                                       # (TB, input_size)

        # ---- global skip: one lane-dense (TB, out_pad) slab -----------------
        skip = (jnp.dot(x, gs_ref[8:8 + input_size, :],
                        preferred_element_type=jnp.float32)
                + gs_ref[0:1, :])

        # ---- dense encoder + dense decoder (fused same-input matmuls) -------
        h = x
        for l_ref, (d_in, hid, d_out) in zip(layer_refs, layer_dims):
            hpad = _round_up(hid, 128)
            r0, r1 = 8, 8 + d_in
            # one dot for [lin1 | skip]  (padded hidden cols are exactly 0)
            z = (jnp.dot(h, l_ref[r0:r1, :],
                         preferred_element_type=jnp.float32)
                 + l_ref[0:1, :])                            # (TB, hpad+d_out)
            a = jnp.maximum(z[:, :hpad], 0.0)                # relu(lin1(x))
            y = (jnp.dot(a, l_ref[r1:r1 + hpad, hpad:],      # lin2 (zero pad rows)
                         preferred_element_type=jnp.float32)
                 + l_ref[1:2, hpad:] + z[:, hpad:])          # + b2 + skip(x)
            mu = jnp.mean(y, axis=-1, keepdims=True)
            var = jnp.mean((y - mu) ** 2, axis=-1, keepdims=True)
            h = ((y - mu) * jax.lax.rsqrt(var + 1e-5)
                 * l_ref[2:3, hpad:] + l_ref[3:4, hpad:])    # (TB, d_out)

        # ---- temporal decoder: shared per-horizon-step weights expressed as
        # block-diagonal matmuls; LayerNorm over c_in via grouping matrix S ---
        z = (jnp.dot(h, ta_ref[8:8 + hdec, :],
                     preferred_element_type=jnp.float32)
             + ta_ref[0:1, :])                               # (TB, htd+out_pad)
        a = jnp.maximum(z[:, :htd], 0.0)
        y = (jnp.dot(a, tb_ref[8 + out_pad:8 + out_pad + htd, :],
                     preferred_element_type=jnp.float32)
             + tb_ref[0:1, :] + z[:, htd:])                  # (TB, out_pad)
        # NOTE: padded columns of y are exactly 0 (weights/biases zero-padded),
        # which keeps the grouped LayerNorm statistics below correct.
        S = tb_ref[8:8 + out_pad, :]
        mu = jnp.dot(y, S, preferred_element_type=jnp.float32)
        var = jnp.dot((y - mu) ** 2, S, preferred_element_type=jnp.float32)
        y = ((y - mu) * jax.lax.rsqrt(var + 1e-5)
             * tb_ref[1:2, :] + tb_ref[2:3, :])

        o_ref[...] = y + skip                 # single unmasked lane-dense store

    return kernel


# ------------------------------ parameter init ------------------------------

def _init_linear_params(key, d_in, d_out, scale=0.05):
    kw, kb = jax.random.split(key)
    w = jax.random.normal(kw, (d_in, d_out), jnp.float32) * scale
    b = jax.random.normal(kb, (1, d_out), jnp.float32) * scale
    return w, b


def _init_mlp_residual_params(key, d_in, d_hidden, d_out):
    k1, k2, k3 = jax.random.split(key, 3)
    w1, b1 = _init_linear_params(k1, d_in, d_hidden)
    w2, b2 = _init_linear_params(k2, d_hidden, d_out)
    ws, bs = _init_linear_params(k3, d_in, d_out)
    return dict(w1=w1, b1=b1, w2=w2, b2=b2, ws=ws, bs=bs,
                gamma=jnp.ones((1, d_out), jnp.float32),
                beta=jnp.zeros((1, d_out), jnp.float32))


def _pack_layer_slab(p, d_in, hidden, d_out):
    """One MLPResidual layer -> one f32 slab.

    rows 0..3 : bcat=[b1|bs], b2, gamma, beta (row vectors)
    rows 8..8+d_in       : [w1 | ws]   (cols [0,hidden) and [hpad, hpad+d_out))
    rows 8+d_in..+hpad   : w2          (cols [hpad, hpad+d_out); pad rows = 0)
    """
    hpad = _round_up(hidden, 128)
    C = hpad + d_out
    R = _round_up(8 + d_in + hpad, 8)
    slab = jnp.zeros((R, C), jnp.float32)
    slab = slab.at[0, :hidden].set(p["b1"][0])
    slab = slab.at[0, hpad:].set(p["bs"][0])
    slab = slab.at[1, hpad:].set(p["b2"][0])
    slab = slab.at[2, hpad:].set(p["gamma"][0])
    slab = slab.at[3, hpad:].set(p["beta"][0])
    slab = slab.at[8:8 + d_in, :hidden].set(p["w1"])
    slab = slab.at[8:8 + d_in, hpad:].set(p["ws"])
    slab = slab.at[8 + d_in:8 + d_in + hidden, hpad:].set(p["w2"])
    return slab


def _pack_gs_slab(gs_w, gs_b, input_size, out_dim, out_pad):
    R = _round_up(8 + input_size, 8)
    slab = jnp.zeros((R, out_pad), jnp.float32)
    slab = slab.at[0, :out_dim].set(gs_b[0])
    slab = slab.at[8:8 + input_size, :out_dim].set(gs_w)
    return slab


def _pack_temporal_slabs(raw, h, c_in, dec_out_dim, temporal_dim, out_pad):
    """Temporal decoder (shared per-step weights) -> block-diagonal slabs."""
    hdec = h * dec_out_dim
    htd = h * temporal_dim
    eye = jnp.eye(h, dtype=jnp.float32)
    bd = lambda w: jnp.kron(eye, w)

    # slab A: [tw1_blockdiag | tws_blockdiag] + fused bias row
    CA = htd + out_pad
    RA = _round_up(8 + hdec, 8)
    slab_a = jnp.zeros((RA, CA), jnp.float32)
    slab_a = slab_a.at[0, :htd].set(jnp.tile(raw["b1"], (1, h))[0])
    slab_a = slab_a.at[0, htd:htd + h * c_in].set(jnp.tile(raw["bs"], (1, h))[0])
    slab_a = slab_a.at[8:8 + hdec, :htd].set(bd(raw["w1"]))
    slab_a = slab_a.at[8:8 + hdec, htd:htd + h * c_in].set(bd(raw["ws"]))

    # slab B: b2 / gamma / beta rows, grouping matrix S, tw2_blockdiag
    RB = 8 + out_pad + htd
    slab_b = jnp.zeros((RB, out_pad), jnp.float32)
    slab_b = slab_b.at[0, :h * c_in].set(jnp.tile(raw["b2"], (1, h))[0])
    slab_b = slab_b.at[1, :h * c_in].set(jnp.tile(raw["gamma"], (1, h))[0])
    slab_b = slab_b.at[2, :h * c_in].set(jnp.tile(raw["beta"], (1, h))[0])
    idx = jnp.arange(out_pad)
    valid = idx < h * c_in
    grp = idx // c_in
    same = (grp[:, None] == grp[None, :]) & valid[:, None] & valid[None, :]
    S = jnp.where(same, 1.0 / c_in, 0.0).astype(jnp.float32)
    slab_b = slab_b.at[8:8 + out_pad, :].set(S)
    slab_b = slab_b.at[8 + out_pad:8 + out_pad + htd, :h * c_in].set(bd(raw["w2"]))
    return slab_a, slab_b


class Config:
    features = "M"     # -> c_in = 7
    pred_len = 8       # h
    seq_len = 8
    c_out = 4          # input_size = seq_len * c_out = 32
    d_model = 32       # hidden_size
    label_len = 4      # decoder_output_dim
    enc_in = 1         # num_encoder_layers
    dec_in = 1         # num_decoder_layers
    factor = 2         # temporal_width (unused: no exogenous features)


def init_model(key, cfg):
    c_in = 1 if cfg.features == "S" else 7
    h = cfg.pred_len
    input_size = cfg.seq_len * cfg.c_out
    hidden = cfg.d_model
    dec_out_dim = cfg.label_len
    temporal_dim = 128
    out_pad = _round_up(h * c_in, 128)

    keys = jax.random.split(key, cfg.enc_in + cfg.dec_in + 2)
    encoder = [_init_mlp_residual_params(
        keys[i], input_size if i == 0 else hidden, hidden, hidden)
        for i in range(cfg.enc_in)]
    decoder = [_init_mlp_residual_params(
        keys[cfg.enc_in + i], hidden, hidden,
        dec_out_dim * h if i == cfg.dec_in - 1 else hidden)
        for i in range(cfg.dec_in)]
    temporal_raw = _init_mlp_residual_params(keys[-2], dec_out_dim,
                                             temporal_dim, c_in)
    gs_w, gs_b = _init_linear_params(keys[-1], input_size, h * c_in)

    layer_dims = []
    for i in range(cfg.enc_in):
        layer_dims.append((input_size if i == 0 else hidden, hidden, hidden))
    for i in range(cfg.dec_in):
        layer_dims.append((hidden, hidden,
                           dec_out_dim * h if i == cfg.dec_in - 1 else hidden))
    layer_raws = encoder + decoder

    params = dict(
        gs_slab=_pack_gs_slab(gs_w, gs_b, input_size, h * c_in, out_pad),
        layer_slabs=[_pack_layer_slab(p, *d)
                     for p, d in zip(layer_raws, layer_dims)],
    )
    ta, tb = _pack_temporal_slabs(temporal_raw, h, c_in, dec_out_dim,
                                  temporal_dim, out_pad)
    params["temporal_a"] = ta
    params["temporal_b"] = tb

    raw = dict(encoder=encoder, decoder=decoder, temporal=temporal_raw,
               gs_w=gs_w, gs_b=gs_b)
    static = dict(h=h, c_in=c_in, dec_out_dim=dec_out_dim, out_pad=out_pad,
                  input_size=input_size, layer_dims=tuple(layer_dims),
                  hdec=h * dec_out_dim, htd=h * temporal_dim)
    return params, raw, static


# ------------------------------- forward pass --------------------------------

_TB_MAX = 128  # batch-tile cap (sweepable: 128/256)


def _choose_tiles(B):
    """Pick batch tile TB (multiple of 8, <= _TB_MAX) and padded batch so the
    grid has >= 2 steps (lets v7x shard the 'parallel' axis over its 2 TCs)."""
    b8 = _round_up(max(B, 1), 8)
    tb = min(_TB_MAX, max(8, (b8 // 2) // 8 * 8))
    b_pad = _round_up(b8, tb)
    if b_pad // tb < 2:
        b_pad = 2 * tb
    return tb, b_pad


def tide_forward(params, static, x_enc, x_mark_enc=None, x_dec=None,
                 x_mark_dec=None):
    """Matches Model.forward (no exogenous features); one fused Pallas call."""
    B, L, C = x_enc.shape
    input_size = static["input_size"]
    h, c_in, out_pad = static["h"], static["c_in"], static["out_pad"]
    assert L * C == input_size

    tb, b_pad = _choose_tiles(B)

    x = x_enc.reshape(B, input_size).astype(jnp.float32)
    if b_pad != B:
        x = jnp.pad(x, ((0, b_pad - B), (0, 0)))

    inputs = ([x, params["gs_slab"]] + list(params["layer_slabs"])
              + [params["temporal_a"], params["temporal_b"]])

    in_specs = [pl.BlockSpec((tb, input_size), lambda i: (i, 0))]
    for a in inputs[1:]:
        # whole weight slab resident in VMEM; same block every grid step
        in_specs.append(pl.BlockSpec(a.shape, lambda i: (0, 0)))

    kernel = _make_fused_kernel(input_size, static["layer_dims"],
                                static["hdec"], static["htd"], out_pad)
    out = pl.pallas_call(
        kernel,
        out_shape=jax.ShapeDtypeStruct((b_pad, out_pad), jnp.float32),
        grid=(b_pad // tb,),
        in_specs=in_specs,
        out_specs=pl.BlockSpec((tb, out_pad), lambda i: (i, 0)),
        compiler_params=pltpu.CompilerParams(
            dimension_semantics=("parallel",)),
    )(*inputs)

    return out[:B, :h * c_in].reshape(B, h, c_in)


# ---------------------------- pure-JAX reference -----------------------------

def _mlp_residual_ref(x, p):
    hp = jax.lax.Precision.HIGHEST
    hdn = jnp.maximum(jnp.dot(x, p["w1"], precision=hp) + p["b1"], 0.0)
    y = jnp.dot(hdn, p["w2"], precision=hp) + p["b2"]
    y = y + jnp.dot(x, p["ws"], precision=hp) + p["bs"]
    mu = jnp.mean(y, axis=-1, keepdims=True)
    var = jnp.mean((y - mu) ** 2, axis=-1, keepdims=True)
    return (y - mu) * jax.lax.rsqrt(var + 1e-5) * p["gamma"] + p["beta"]


def tide_forward_ref(raw, static, x_enc):
    B, L, C = x_enc.shape
    h, c_in, dec = static["h"], static["c_in"], static["dec_out_dim"]
    hp = jax.lax.Precision.HIGHEST
    x = x_enc.reshape(B, L * C).astype(jnp.float32)
    skip = (jnp.dot(x, raw["gs_w"], precision=hp) + raw["gs_b"]).reshape(B, h, c_in)
    for p in raw["encoder"]:
        x = _mlp_residual_ref(x, p)
    for p in raw["decoder"]:
        x = _mlp_residual_ref(x, p)
    x = x.reshape(B, h, dec)
    y = _mlp_residual_ref(x, raw["temporal"])
    return y + skip


# ----------------------------------- main ------------------------------------

if __name__ == "__main__":
    cfg = Config()
    key = jax.random.PRNGKey(0)
    k_params, k_data = jax.random.split(key)

    params, raw, static = init_model(k_params, cfg)

    B = 2
    x_enc = jax.random.normal(k_data, (B, cfg.seq_len, cfg.c_out), jnp.float32)
    x_mark_enc = jnp.zeros((B, cfg.seq_len, 4), jnp.float32)       # unused
    x_dec = jnp.zeros((B, cfg.label_len + cfg.pred_len, cfg.c_out), jnp.float32)
    x_mark_dec = jnp.zeros((B, cfg.label_len + cfg.pred_len, 4), jnp.float32)

    fwd = jax.jit(functools.partial(tide_forward, params, static))
    out = jax.block_until_ready(fwd(x_enc, x_mark_enc, x_dec, x_mark_dec))

    assert out.shape == (B, cfg.pred_len, 7), out.shape
    assert bool(jnp.all(jnp.isfinite(out)))

    # correctness check against a pure-JAX reference of the same math
    ref = tide_forward_ref(raw, static, x_enc)
    err = float(jnp.max(jnp.abs(out - ref)))
    assert err < 2e-2, f"max |pallas - ref| = {err}"

    print("KERNEL_OK")
</pallas_src>

<mosaic_0001>
module attributes {stable_mosaic.version = 11 : i64} {
  func.func @kernel(%arg0: i32, %arg1: memref<8x32xf32, #tpu.memory_space<vmem>>, %arg2: memref<40x128xf32, #tpu.memory_space<vmem>>, %arg3: memref<168x160xf32, #tpu.memory_space<vmem>>, %arg4: memref<168x160xf32, #tpu.memory_space<vmem>>, %arg5: memref<40x1152xf32, #tpu.memory_space<vmem>>, %arg6: memref<1160x128xf32, #tpu.memory_space<vmem>>, %arg7: memref<8x128xf32, #tpu.memory_space<vmem>>) attributes {dimension_semantics = [#tpu.dimension_semantics<parallel>], iteration_bounds = array<i64: 2>, scalar_prefetch = 0 : i64, scratch_operands = 0 : i64, tpu.core_type = #tpu.core_type<tc>, window_params = [{transform_indices = @transform_0, window_bounds = array<i64: 8, 32>}, {pipeline_mode = #tpu.pipeline_mode<synchronous>, transform_indices = @transform_1, window_bounds = array<i64: 40, 128>}, {pipeline_mode = #tpu.pipeline_mode<synchronous>, transform_indices = @transform_2, window_bounds = array<i64: 168, 160>}, {pipeline_mode = #tpu.pipeline_mode<synchronous>, transform_indices = @transform_3, window_bounds = array<i64: 168, 160>}, {pipeline_mode = #tpu.pipeline_mode<synchronous>, transform_indices = @transform_4, window_bounds = array<i64: 40, 1152>}, {pipeline_mode = #tpu.pipeline_mode<synchronous>, transform_indices = @transform_5, window_bounds = array<i64: 1160, 128>}, {transform_indices = @transform_6, window_bounds = array<i64: 8, 128>}]} {
    %c0 = arith.constant 0 : index
    %c0_0 = arith.constant 0 : index
    %0 = vector.load %arg1[%c0, %c0_0] : memref<8x32xf32, #tpu.memory_space<vmem>>, vector<8x32xf32>
    %c8 = arith.constant 8 : index
    %c0_1 = arith.constant 0 : index
    %1 = vector.load %arg2[%c8, %c0_1] : memref<40x128xf32, #tpu.memory_space<vmem>>, vector<32x128xf32>
    %cst = arith.constant dense<0.000000e+00> : vector<8x128xf32>
    %2 = tpu.matmul %0, %1, %cst {dimension_numbers = #tpu.dot_dimension_numbers<[1], [0], [0], [1], [0, 0, 1, 1], [], []>} : vector<8x32xf32>, vector<32x128xf32>, vector<8x128xf32> -> vector<8x128xf32>
    %c0_2 = arith.constant 0 : index
    %c0_3 = arith.constant 0 : index
    %3 = vector.load %arg2[%c0_2, %c0_3] : memref<40x128xf32, #tpu.memory_space<vmem>>, vector<1x128xf32>
    %4 = vector.broadcast %3 : vector<1x128xf32> to vector<8x128xf32>
    %5 = arith.addf %2, %4 : vector<8x128xf32>
    %c8_4 = arith.constant 8 : index
    %c0_5 = arith.constant 0 : index
    %6 = vector.load %arg3[%c8_4, %c0_5] : memref<168x160xf32, #tpu.memory_space<vmem>>, vector<32x160xf32>
    %cst_6 = arith.constant dense<0.000000e+00> : vector<8x160xf32>
    %7 = tpu.matmul %0, %6, %cst_6 {dimension_numbers = #tpu.dot_dimension_numbers<[1], [0], [0], [1], [0, 0, 1, 1], [], []>} : vector<8x32xf32>, vector<32x160xf32>, vector<8x160xf32> -> vector<8x160xf32>
    %c0_7 = arith.constant 0 : index
    %c0_8 = arith.constant 0 : index
    %8 = vector.load %arg3[%c0_7, %c0_8] : memref<168x160xf32, #tpu.memory_space<vmem>>, vector<1x160xf32>
    %9 = vector.broadcast %8 : vector<1x160xf32> to vector<8x160xf32>
    %10 = arith.addf %7, %9 : vector<8x160xf32>
    %11 = vector.extract_strided_slice %10 {offsets = [0, 0], sizes = [8, 128], strides = [1, 1]} : vector<8x160xf32> to vector<8x128xf32>
    %cst_9 = arith.constant 0.000000e+00 : f32
    %12 = vector.broadcast %cst_9 : f32 to vector<8x128xf32>
    %13 = arith.maximumf %11, %12 : vector<8x128xf32>
    %c40 = arith.constant 40 : index
    %c128 = arith.constant 128 : index
    %14 = vector.load %arg3[%c40, %c128] : memref<168x160xf32, #tpu.memory_space<vmem>>, vector<128x32xf32>
    %cst_10 = arith.constant dense<0.000000e+00> : vector<8x32xf32>
    %15 = tpu.matmul %13, %14, %cst_10 {dimension_numbers = #tpu.dot_dimension_numbers<[1], [0], [0], [1], [0, 0, 1, 1], [], []>} : vector<8x128xf32>, vector<128x32xf32>, vector<8x32xf32> -> vector<8x32xf32>
    %c1 = arith.constant 1 : index
    %c128_11 = arith.constant 128 : index
    %16 = vector.load %arg3[%c1, %c128_11] : memref<168x160xf32, #tpu.memory_space<vmem>>, vector<1x32xf32>
    %17 = vector.broadcast %16 : vector<1x32xf32> to vector<8x32xf32>
    %18 = arith.addf %15, %17 : vector<8x32xf32>
    %19 = vector.extract_strided_slice %10 {offsets = [0, 128], sizes = [8, 32], strides = [1, 1]} : vector<8x160xf32> to vector<8x32xf32>
    %20 = arith.addf %18, %19 : vector<8x32xf32>
    %cst_12 = arith.constant dense<0.000000e+00> : vector<8xf32>
    %21 = vector.multi_reduction <add>, %20, %cst_12 [1] : vector<8x32xf32> to vector<8xf32>
    %22 = vector.shape_cast %21 : vector<8xf32> to vector<8x1xf32>
    %cst_13 = arith.constant 3.200000e+01 : f32
    %23 = vector.broadcast %cst_13 : f32 to vector<8x1xf32>
    %24 = arith.divf %22, %23 : vector<8x1xf32>
    %25 = vector.broadcast %24 : vector<8x1xf32> to vector<8x32xf32>
    %26 = arith.subf %20, %25 : vector<8x32xf32>
    %27 = arith.mulf %26, %26 : vector<8x32xf32>
    %cst_14 = arith.constant dense<0.000000e+00> : vector<8xf32>
    %28 = vector.multi_reduction <add>, %27, %cst_14 [1] : vector<8x32xf32> to vector<8xf32>
    %29 = vector.shape_cast %28 : vector<8xf32> to vector<8x1xf32>
    %cst_15 = arith.constant 3.200000e+01 : f32
    %30 = vector.broadcast %cst_15 : f32 to vector<8x1xf32>
    %31 = arith.divf %29, %30 : vector<8x1xf32>
    %32 = vector.broadcast %24 : vector<8x1xf32> to vector<8x32xf32>
    %33 = arith.subf %20, %32 : vector<8x32xf32>
    %cst_16 = arith.constant 9.99999974E-6 : f32
    %34 = vector.broadcast %cst_16 : f32 to vector<8x1xf32>
    %35 = arith.addf %31, %34 : vector<8x1xf32>
    %36 = math.rsqrt %35 : vector<8x1xf32>
    %37 = vector.broadcast %36 : vector<8x1xf32> to vector<8x32xf32>
    %38 = arith.mulf %33, %37 : vector<8x32xf32>
    %c2 = arith.constant 2 : index
    %c128_17 = arith.constant 128 : index
    %39 = vector.load %arg3[%c2, %c128_17] : memref<168x160xf32, #tpu.memory_space<vmem>>, vector<1x32xf32>
    %40 = vector.broadcast %39 : vector<1x32xf32> to vector<8x32xf32>
    %41 = arith.mulf %38, %40 : vector<8x32xf32>
    %c3 = arith.constant 3 : index
    %c128_18 = arith.constant 128 : index
    %42 = vector.load %arg3[%c3, %c128_18] : memref<168x160xf32, #tpu.memory_space<vmem>>, vector<1x32xf32>
    %43 = vector.broadcast %42 : vector<1x32xf32> to vector<8x32xf32>
    %44 = arith.addf %41, %43 : vector<8x32xf32>
    %c8_19 = arith.constant 8 : index
    %c0_20 = arith.constant 0 : index
    %45 = vector.load %arg4[%c8_19, %c0_20] : memref<168x160xf32, #tpu.memory_space<vmem>>, vector<32x160xf32>
    %cst_21 = arith.constant dense<0.000000e+00> : vector<8x160xf32>
    %46 = tpu.matmul %44, %45, %cst_21 {dimension_numbers = #tpu.dot_dimension_numbers<[1], [0], [0], [1], [0, 0, 1, 1], [], []>} : vector<8x32xf32>, vector<32x160xf32>, vector<8x160xf32> -> vector<8x160xf32>
    %c0_22 = arith.constant 0 : index
    %c0_23 = arith.constant 0 : index
    %47 = vector.load %arg4[%c0_22, %c0_23] : memref<168x160xf32, #tpu.memory_space<vmem>>, vector<1x160xf32>
    %48 = vector.broadcast %47 : vector<1x160xf32> to vector<8x160xf32>
    %49 = arith.addf %46, %48 : vector<8x160xf32>
    %50 = vector.extract_strided_slice %49 {offsets = [0, 0], sizes = [8, 128], strides = [1, 1]} : vector<8x160xf32> to vector<8x128xf32>
    %cst_24 = arith.constant 0.000000e+00 : f32
    %51 = vector.broadcast %cst_24 : f32 to vector<8x128xf32>
    %52 = arith.maximumf %50, %51 : vector<8x128xf32>
    %c40_25 = arith.constant 40 : index
    %c128_26 = arith.constant 128 : index
    %53 = vector.load %arg4[%c40_25, %c128_26] : memref<168x160xf32, #tpu.memory_space<vmem>>, vector<128x32xf32>
    %cst_27 = arith.constant dense<0.000000e+00> : vector<8x32xf32>
    %54 = tpu.matmul %52, %53, %cst_27 {dimension_numbers = #tpu.dot_dimension_numbers<[1], [0], [0], [1], [0, 0, 1, 1], [], []>} : vector<8x128xf32>, vector<128x32xf32>, vector<8x32xf32> -> vector<8x32xf32>
    %c1_28 = arith.constant 1 : index
    %c128_29 = arith.constant 128 : index
    %55 = vector.load %arg4[%c1_28, %c128_29] : memref<168x160xf32, #tpu.memory_space<vmem>>, vector<1x32xf32>
    %56 = vector.broadcast %55 : vector<1x32xf32> to vector<8x32xf32>
    %57 = arith.addf %54, %56 : vector<8x32xf32>
    %58 = vector.extract_strided_slice %49 {offsets = [0, 128], sizes = [8, 32], strides = [1, 1]} : vector<8x160xf32> to vector<8x32xf32>
    %59 = arith.addf %57, %58 : vector<8x32xf32>
    %cst_30 = arith.constant dense<0.000000e+00> : vector<8xf32>
    %60 = vector.multi_reduction <add>, %59, %cst_30 [1] : vector<8x32xf32> to vector<8xf32>
    %61 = vector.shape_cast %60 : vector<8xf32> to vector<8x1xf32>
    %cst_31 = arith.constant 3.200000e+01 : f32
    %62 = vector.broadcast %cst_31 : f32 to vector<8x1xf32>
    %63 = arith.divf %61, %62 : vector<8x1xf32>
    %64 = vector.broadcast %63 : vector<8x1xf32> to vector<8x32xf32>
    %65 = arith.subf %59, %64 : vector<8x32xf32>
    %66 = arith.mulf %65, %65 : vector<8x32xf32>
    %cst_32 = arith.constant dense<0.000000e+00> : vector<8xf32>
    %67 = vector.multi_reduction <add>, %66, %cst_32 [1] : vector<8x32xf32> to vector<8xf32>
    %68 = vector.shape_cast %67 : vector<8xf32> to vector<8x1xf32>
    %cst_33 = arith.constant 3.200000e+01 : f32
    %69 = vector.broadcast %cst_33 : f32 to vector<8x1xf32>
    %70 = arith.divf %68, %69 : vector<8x1xf32>
    %71 = vector.broadcast %63 : vector<8x1xf32> to vector<8x32xf32>
    %72 = arith.subf %59, %71 : vector<8x32xf32>
    %cst_34 = arith.constant 9.99999974E-6 : f32
    %73 = vector.broadcast %cst_34 : f32 to vector<8x1xf32>
    %74 = arith.addf %70, %73 : vector<8x1xf32>
    %75 = math.rsqrt %74 : vector<8x1xf32>
    %76 = vector.broadcast %75 : vector<8x1xf32> to vector<8x32xf32>
    %77 = arith.mulf %72, %76 : vector<8x32xf32>
    %c2_35 = arith.constant 2 : index
    %c128_36 = arith.constant 128 : index
    %78 = vector.load %arg4[%c2_35, %c128_36] : memref<168x160xf32, #tpu.memory_space<vmem>>, vector<1x32xf32>
    %79 = vector.broadcast %78 : vector<1x32xf32> to vector<8x32xf32>
    %80 = arith.mulf %77, %79 : vector<8x32xf32>
    %c3_37 = arith.constant 3 : index
    %c128_38 = arith.constant 128 : index
    %81 = vector.load %arg4[%c3_37, %c128_38] : memref<168x160xf32, #tpu.memory_space<vmem>>, vector<1x32xf32>
    %82 = vector.broadcast %81 : vector<1x32xf32> to vector<8x32xf32>
    %83 = arith.addf %80, %82 : vector<8x32xf32>
    %c8_39 = arith.constant 8 : index
    %c0_40 = arith.constant 0 : index
    %84 = vector.load %arg5[%c8_39, %c0_40] : memref<40x1152xf32, #tpu.memory_space<vmem>>, vector<32x1152xf32>
    %cst_41 = arith.constant dense<0.000000e+00> : vector<8x1152xf32>
    %85 = tpu.matmul %83, %84, %cst_41 {dimension_numbers = #tpu.dot_dimension_numbers<[1], [0], [0], [1], [0, 0, 1, 1], [], []>} : vector<8x32xf32>, vector<32x1152xf32>, vector<8x1152xf32> -> vector<8x1152xf32>
    %c0_42 = arith.constant 0 : index
    %c0_43 = arith.constant 0 : index
    %86 = vector.load %arg5[%c0_42, %c0_43] : memref<40x1152xf32, #tpu.memory_space<vmem>>, vector<1x1152xf32>
    %87 = vector.broadcast %86 : vector<1x1152xf32> to vector<8x1152xf32>
    %88 = arith.addf %85, %87 : vector<8x1152xf32>
    %89 = vector.extract_strided_slice %88 {offsets = [0, 0], sizes = [8, 1024], strides = [1, 1]} : vector<8x1152xf32> to vector<8x1024xf32>
    %cst_44 = arith.constant 0.000000e+00 : f32
    %90 = vector.broadcast %cst_44 : f32 to vector<8x1024xf32>
    %91 = arith.maximumf %89, %90 : vector<8x1024xf32>
    %c136 = arith.constant 136 : index
    %c0_45 = arith.constant 0 : index
    %92 = vector.load %arg6[%c136, %c0_45] : memref<1160x128xf32, #tpu.memory_space<vmem>>, vector<1024x128xf32>
    %cst_46 = arith.constant dense<0.000000e+00> : vector<8x128xf32>
    %93 = tpu.matmul %91, %92, %cst_46 {dimension_numbers = #tpu.dot_dimension_numbers<[1], [0], [0], [1], [0, 0, 1, 1], [], []>} : vector<8x1024xf32>, vector<1024x128xf32>, vector<8x128xf32> -> vector<8x128xf32>
    %c0_47 = arith.constant 0 : index
    %c0_48 = arith.constant 0 : index
    %94 = vector.load %arg6[%c0_47, %c0_48] : memref<1160x128xf32, #tpu.memory_space<vmem>>, vector<1x128xf32>
    %95 = vector.broadcast %94 : vector<1x128xf32> to vector<8x128xf32>
    %96 = arith.addf %93, %95 : vector<8x128xf32>
    %97 = vector.extract_strided_slice %88 {offsets = [0, 1024], sizes = [8, 128], strides = [1, 1]} : vector<8x1152xf32> to vector<8x128xf32>
    %98 = arith.addf %96, %97 : vector<8x128xf32>
    %c8_49 = arith.constant 8 : index
    %c0_50 = arith.constant 0 : index
    %99 = vector.load %arg6[%c8_49, %c0_50] : memref<1160x128xf32, #tpu.memory_space<vmem>>, vector<128x128xf32>
    %cst_51 = arith.constant dense<0.000000e+00> : vector<8x128xf32>
    %100 = tpu.matmul %98, %99, %cst_51 {dimension_numbers = #tpu.dot_dimension_numbers<[1], [0], [0], [1], [0, 0, 1, 1], [], []>} : vector<8x128xf32>, vector<128x128xf32>, vector<8x128xf32> -> vector<8x128xf32>
    %101 = arith.subf %98, %100 : vector<8x128xf32>
    %102 = arith.mulf %101, %101 : vector<8x128xf32>
    %cst_52 = arith.constant dense<0.000000e+00> : vector<8x128xf32>
    %103 = tpu.matmul %102, %99, %cst_52 {dimension_numbers = #tpu.dot_dimension_numbers<[1], [0], [0], [1], [0, 0, 1, 1], [], []>} : vector<8x128xf32>, vector<128x128xf32>, vector<8x128xf32> -> vector<8x128xf32>
    %104 = arith.subf %98, %100 : vector<8x128xf32>
    %cst_53 = arith.constant 9.99999974E-6 : f32
    %105 = vector.broadcast %cst_53 : f32 to vector<8x128xf32>
    %106 = arith.addf %103, %105 : vector<8x128xf32>
    %107 = math.rsqrt %106 : vector<8x128xf32>
    %108 = arith.mulf %104, %107 : vector<8x128xf32>
    %c1_54 = arith.constant 1 : index
    %c0_55 = arith.constant 0 : index
    %109 = vector.load %arg6[%c1_54, %c0_55] : memref<1160x128xf32, #tpu.memory_space<vmem>>, vector<1x128xf32>
    %110 = vector.broadcast %109 : vector<1x128xf32> to vector<8x128xf32>
    %111 = arith.mulf %108, %110 : vector<8x128xf32>
    %c2_56 = arith.constant 2 : index
    %c0_57 = arith.constant 0 : index
    %112 = vector.load %arg6[%c2_56, %c0_57] : memref<1160x128xf32, #tpu.memory_space<vmem>>, vector<1x128xf32>
    %113 = vector.broadcast %112 : vector<1x128xf32> to vector<8x128xf32>
    %114 = arith.addf %111, %113 : vector<8x128xf32>
    %115 = arith.addf %114, %5 : vector<8x128xf32>
    %c0_58 = arith.constant 0 : index
    %c0_59 = arith.constant 0 : index
    %116 = vector.load %arg7[%c0_58, %c0_59] : memref<8x128xf32, #tpu.memory_space<vmem>>, vector<8x128xf32>
    tpu.vector_store %arg7[%c0_58, %c0_59], %115 {strides = array<i32>} : memref<8x128xf32, #tpu.memory_space<vmem>>, vector<8x128xf32>,
    return
  }
  func.func @transform_0(%arg0: i32) -> (i32, i32) {
    %c0_i32 = arith.constant 0 : i32
    %c0_i32_0 = arith.constant 0 : i32
    return %arg0, %c0_i32 : i32, i32
  }
  func.func @transform_1(%arg0: i32) -> (i32, i32) {
    %c0_i32 = arith.constant 0 : i32
    %c0_i32_0 = arith.constant 0 : i32
    %c0_i32_1 = arith.constant 0 : i32
    return %c0_i32, %c0_i32_0 : i32, i32
  }
  func.func @transform_2(%arg0: i32) -> (i32, i32) {
    %c0_i32 = arith.constant 0 : i32
    %c0_i32_0 = arith.constant 0 : i32
    %c0_i32_1 = arith.constant 0 : i32
    return %c0_i32, %c0_i32_0 : i32, i32
  }
  func.func @transform_3(%arg0: i32) -> (i32, i32) {
    %c0_i32 = arith.constant 0 : i32
    %c0_i32_0 = arith.constant 0 : i32
    %c0_i32_1 = arith.constant 0 : i32
    return %c0_i32, %c0_i32_0 : i32, i32
  }
  func.func @transform_4(%arg0: i32) -> (i32, i32) {
    %c0_i32 = arith.constant 0 : i32
    %c0_i32_0 = arith.constant 0 : i32
    %c0_i32_1 = arith.constant 0 : i32
    return %c0_i32, %c0_i32_0 : i32, i32
  }
  func.func @transform_5(%arg0: i32) -> (i32, i32) {
    %c0_i32 = arith.constant 0 : i32
    %c0_i32_0 = arith.constant 0 : i32
    %c0_i32_1 = arith.constant 0 : i32
    return %c0_i32, %c0_i32_0 : i32, i32
  }
  func.func @transform_6(%arg0: i32) -> (i32, i32) {
    %c0_i32 = arith.constant 0 : i32
    %c0_i32_0 = arith.constant 0 : i32
    return %arg0, %c0_i32 : i32, i32
  }
}

</mosaic_0001>

<bundles_post_ra>
// kernel: tide_forward.1
= control target key start
LH: loop header
LB: loop body
LE: loop exit
PB: predicated region body
PF: predicated region fallthrough
CT: control target
= control target key end

     0   :  { %11 = vsyncpa [#allocation3], 0  ;;  %s3145_s0 = inlined_call_operand.vmem [shape: f32[16,32], index: 0, kind: input, shape index: {}]   ;;  %s3146_s1 = inlined_call_operand.vmem [shape: f32[40,128], index: 1, kind: input, shape index: {}]   ;;  %s3147_s2 = inlined_call_operand.hbm [shape: f32[168,160], index: 2, kind: input, shape index: {}]   ;;  %s3148_s3 = inlined_call_operand.hbm [shape: f32[168,160], index: 3, kind: input, shape index: {}]   ;;  %s3149_s4 = inlined_call_operand.hbm [shape: f32[40,1152], index: 4, kind: input, shape index: {}]   ;;  %s3150_s5 = inlined_call_operand.hbm [shape: f32[1160,128], index: 5, kind: input, shape index: {}]   ;;  %s3151_s6 = inlined_call_operand.vmem [shape: f32[16,128], index: 6, kind: output, shape index: {}]  }
   0x1   :  { %12 = vsyncpa [#allocation5], 0 }
   0x2   :  { %13 = vsyncpa [#allocation8], 0  ;;  %s2860_s21 = smov 0  }
   0x3 LB: > { %s2866_s22 = sadd.s32 4294967295, %s2810_s21   ;;  %p1925_p0 = scmp.ge.s32.totalorder %s2810_s21, 1  ;;  %s2810_s21 = sphi %s2860_s21, %s19_s21  }
   0x4   : > { %p181_p1 = scmp.lt.s32.totalorder %s2810_s21, 3  ;;  %p3152_p2 = scmp.eq.s32.totalorder %s2866_s22, 0 }
   0x5   : > { %s2812_s24 = smov [#allocation4]   ;;  %s2813_s26 = smov [#allocation2]  }
   0x6   : > { %p2871_p3 = pnand %p1925_p0, %p181_p1  ;;  %s209_s25 = sshll.u32 %s2812_s24, 4  ;;  %s2875_s25 = int_to_ptr.vmem [resolvable:$true] %s209_s25 }
   0x7   : > { %s196_s27 = sshll.u32 %s2813_s26, 4  ;;  %s2814_s29 = smov [#allocation6]   ;;  %s2879_s27 = int_to_ptr.vmem [resolvable:$true] %s196_s27 }
   0x8   : > { %s3154_s23 = scalar_select %p2871_p3, 1, 0 }
   0x9   : > { %p2632_p4 = pneg %p2871_p3  ;;  %s222_s30 = sshll.u32 %s2814_s29, 4  ;;  %s2887_s30 = int_to_ptr.vmem [resolvable:$true] %s222_s30 }
   0xa   : > { %s2680_s9 = scalar_lea.hbm %s3148_s3, 5376 }
   0xb   : > { %p2883_p5 = pnand %p3152_p2, %p2632_p4  ;;  %p2681_p6 = scmp.ne.s32.totalorder %s3148_s3, %s2680_s9 }
   0xc   : > { %p2687_p10 = scmp.lt.u32.totalorder %s2680_s9, %s3148_s3 }
   0xd   : > { %p2897_p7 = pneg %p2883_p5 }
   0xf   : > { %p2683_p8 = pnand %p2897_p7, %p2681_p6 }
  0x11   : > { %p2684_p9 = pneg %p2683_p8 }
  0x13   : > { %p2689_p11 = pnand %p2687_p10, %p2684_p9 }
  0x15   : > { %2692 = shalt.err (!%p2689_p11)
}
  0x16   : > { %s2693_s15 = scalar_lea.vmem %s2875_s25, 5376  ;;  %p2701_p1 = scmp.lt.s32.totalorder %s2875_s25, %s2875_s25 }
  0x17   : > { %p2694_p12 = scmp.ne.s32.totalorder %s2875_s25, %s2693_s15  ;;  %p2702_p4 = scmp.lt.s32.totalorder %s2693_s15, %s2693_s15 }
  0x19   : > { %p2696_p13 = pnand %p2694_p12, %p2897_p7  ;;  %p2703_p6 = por %p2702_p4, %p2701_p1 }
  0x1b   : > { %p2697_p0 = pneg %p2696_p13 }
  0x1d   : > { %p2704_p8 = pnand %p2703_p6, %p2697_p0 }
  0x1f   : > { %2707 = shalt.err (!%p2704_p8)
}
  0x20   : > { %s2815_s16 = smov 256   ;;  %s2816_s17 = smov 16  }
  0x21   : > { %2638 = dma.hbm_to_vmem [thread:$0]  (!%p2883_p5), %s3148_s3, 5376, %s2875_s25, [#allocation5], %s2815_s16, %s2815_s16, %s2816_s17  }
  0x22   : > { %s2708_s26 = scalar_lea.hbm %s3147_s2, 5376 }
  0x23   : > { %p2709_p9 = scmp.ne.s32.totalorder %s3147_s2, %s2708_s26  ;;  %p2715_p12 = scmp.lt.u32.totalorder %s2708_s26, %s3147_s2 }
  0x25   : > { %p2711_p10 = pnand %p2709_p9, %p2897_p7 }
  0x27   : > { %p2712_p11 = pneg %p2711_p10 }
  0x29   : > { %p2717_p13 = pnand %p2715_p12, %p2712_p11 }
  0x2b   : > { %2720 = shalt.err (!%p2717_p13)
}
  0x2c   : > { %s2721_s25 = scalar_lea.vmem %s2879_s27, 5376  ;;  %p2729_p6 = scmp.lt.s32.totalorder %s2879_s27, %s2879_s27 }
  0x2d   : > { %p2722_p0 = scmp.ne.s32.totalorder %s2879_s27, %s2721_s25  ;;  %p2730_p8 = scmp.lt.s32.totalorder %s2721_s25, %s2721_s25 }
  0x2f   : > { %p2724_p1 = pnand %p2722_p0, %p2897_p7  ;;  %p2731_p9 = por %p2730_p8, %p2729_p6 }
  0x31   : > { %p2725_p4 = pneg %p2724_p1 }
  0x33   : > { %p2732_p10 = pnand %p2731_p9, %p2725_p4 }
  0x35   : > { %2735 = shalt.err (!%p2732_p10)
}
  0x36   : > { %2635 = dma.hbm_to_vmem [thread:$0]  (!%p2883_p5), %s3147_s2, 5376, %s2879_s27, [#allocation3], %s2815_s16, %s2815_s16, %s2816_s17  }
  0x37   : > { %s2736_s15 = scalar_lea.hbm %s3149_s4, 5760 }
  0x38   : > { %p2737_p11 = scmp.ne.s32.totalorder %s3149_s4, %s2736_s15  ;;  %p2743_p0 = scmp.lt.u32.totalorder %s2736_s15, %s3149_s4 }
  0x3a   : > { %p2739_p12 = pnand %p2737_p11, %p2897_p7 }
  0x3c   : > { %p2740_p13 = pneg %p2739_p12 }
  0x3e   : > { %p2745_p1 = pnand %p2743_p0, %p2740_p13 }
  0x40   : > { %2748 = shalt.err (!%p2745_p1)
}
  0x41   : > { %s2749_s27 = scalar_lea.vmem %s2887_s30, 5760  ;;  %p2757_p9 = scmp.lt.s32.totalorder %s2887_s30, %s2887_s30 }
  0x42   : > { %p2750_p4 = scmp.ne.s32.totalorder %s2887_s30, %s2749_s27  ;;  %p2758_p10 = scmp.lt.s32.totalorder %s2749_s27, %s2749_s27 }
  0x44   : > { %p2752_p6 = pnand %p2750_p4, %p2897_p7  ;;  %p2759_p11 = por %p2758_p10, %p2757_p9 }
  0x46   : > { %p2753_p8 = pneg %p2752_p6 }
  0x48   : > { %p2760_p12 = pnand %p2759_p11, %p2753_p8 }
  0x4a   : > { %2763 = shalt.err (!%p2760_p12)
}
  0x4b   : > { %s2817_s16 = smov 1152   ;;  %s2818_s17 = smov 72  }
  0x4c   : > { %2641 = dma.hbm_to_vmem [thread:$0]  (!%p2883_p5), %s3149_s4, 5760, %s2887_s30, [#allocation5], %s2817_s16, %s2817_s16, %s2818_s17  }
  0x4d   : > { %s2819_s7 = smov [#allocation7]   ;;  %s2764_s10 = scalar_lea.hbm %s3150_s5, 18560 }
  0x4e   : > { %s235_s8 = sshll.u32 %s2819_s7, 4  ;;  %p2765_p13 = scmp.ne.s32.totalorder %s3150_s5, %s2764_s10  ;;  %s236_s8 = int_to_ptr.vmem [resolvable:$true] %s235_s8 }
  0x4f   : > { %p2771_p4 = scmp.lt.u32.totalorder %s2764_s10, %s3150_s5 }
  0x50   : > { %p2767_p0 = pnand %p2765_p13, %p2897_p7 }
  0x52   : > { %p2768_p1 = pneg %p2767_p0 }
  0x54   : > { %p2773_p6 = pnand %p2771_p4, %p2768_p1 }
  0x56   : > { %2776 = shalt.err (!%p2773_p6)
}
  0x57   : > { %s2777_s30 = scalar_lea.vmem %s236_s8, 18560  ;;  %p2785_p11 = scmp.lt.s32.totalorder %s236_s8, %s236_s8 }
  0x58   : > { %p2778_p8 = scmp.ne.s32.totalorder %s236_s8, %s2777_s30  ;;  %p2786_p12 = scmp.lt.s32.totalorder %s2777_s30, %s2777_s30 }
  0x5a   : > { %p2780_p9 = pnand %p2778_p8, %p2897_p7  ;;  %p2787_p2 = por %p2786_p12, %p2785_p11 }
  0x5c   : > { %p2781_p10 = pneg %p2780_p9 }
  0x5e   : > { %p2788_p3 = pnand %p2787_p2, %p2781_p10 }
  0x60   : > { %2791 = shalt.err (!%p2788_p3)
}
  0x61   : > { %s2820_s18 = smov 128   ;;  %s2821_s19 = smov 8  }
  0x62   : > { %2644 = dma.hbm_to_vmem [thread:$0]  (!%p2883_p5), %s3150_s5, 18560, %s236_s8, [#allocation8], %s2820_s18, %s2820_s18, %s2821_s19  }
  0x63   : > { %p3157_p13 = scmp.ne.s32.totalorder %s3154_s23, 0 }
  0x64   : > { %p3158_p0 = scmp.eq.s32.totalorder (!%p3157_p13), %s2866_s22, 0 }
  0x65   : > { %258 = sbr.rel (%p3157_p13) target bundleno = 2543 (0x9ef), region = 44 }
  0x6c   : > { %2797 = dma.done.wait (%p3158_p0), [#allocation3], 5376   ;;  %p3159_p7 = pmov %p3158_p0 }
  0x6d   : > { %p3160_p2 = pmov %p3158_p0 }
  0x6e   : > { %2799 = vsyncadd (%p3159_p7), [#allocation3], 4294961920 }
  0x6f   : > { %2801 = dma.done.wait (%p3160_p2), [#allocation5], 11136   ;;  %p3161_p3 = pmov %p3158_p0 }
  0x70   : > { %p3162_p1 = pmov %p3158_p0 }
  0x71   : > { %2803 = vsyncadd (%p3161_p3), [#allocation5], 4294956160 }
  0x72   : > { %2805 = dma.done.wait (%p3162_p1), [#allocation8], 18560   ;;  %p3163_p5 = pmov %p3158_p0 }
  0x73   : > { %v2822_v0 = vmov 0.0   ;;  %p298_p4 = scmp.lt.s32.totalorder %s2866_s22, 1  ;;  %v2823_v1 = vmov 0.0|0.0   ;;  %vm2824_vm0 = vmmov 0   ;;  %v391_v2 = vld [vmem:[#allocation2 + $0x18] sm:$0xff]  ;;  %v393_v3 = vld [vmem:[#allocation2 + $0x28] sm:$0xff]  ;;  %v400_v45 = vlaneseq }
  0x74   : > { %2807 = vsyncadd (%p3163_p5), [#allocation8], 4294948736  ;;  %474 = vmatprep.mubr.f32.mxu1 %v2822_v0  ;;  %2332 = vmatprep.subr.bf16.mxu0 %v2823_v1  ;;  %v390_v4 = vld [vmem:[#allocation2 + $0x10] sm:$0xff]  ;;  %v2338_v5 = vpack.c.bf16 %v393_v3, %v391_v2  ;;  %v392_v6 = vld [vmem:[#allocation2 + $0x20] sm:$0xff]  ;;  %vm316_vm1 = vcmask 261120  }
  0x75   : > { %2178 = vmatprep.mubr.msk.f32.mxu0 %vm2824_vm0, %v2822_v0  ;;  %s3165_s22 = smov (!%p298_p4, %s2866_s22), 1  ;;  %v395_v7 = vld [vmem:[#allocation2 + $0x38] sm:$0xff]  ;;  %v397_v8 = vld [vmem:[#allocation2 + $0x48] sm:$0xff]  ;;  %v2340_v9 = vpack.c.bf16 %v392_v6, %v390_v4  ;;  %v394_v11 = vld [vmem:[#allocation2 + $0x30] sm:$0xff]  ;;  %v3036_v46 = vshrl.u32 %v400_v45, 7 }
  0x76   : > { %v2342_v10 = vpack.c.bf16 %v397_v8, %v395_v7  ;;  %v396_v12 = vld [vmem:[#allocation2 + $0x40] sm:$0xff]  ;;  %s1936_s23 = sshll.u32 %s3165_s22, 3  ;;  %2339 = vmatprep.subr.bf16.mxu1 %v2338_v5  ;;  %v307_v13 = vld [vmem:[%s3146_s1 + $0x8] sm:$0xff]  ;;  %v308_v14 = vld [vmem:[%s3146_s1 + $0x10] sm:$0xff] }
  0x77   : > { %v309_v15 = vld [vmem:[%s3146_s1 + $0x18] sm:$0xff]  ;;  %2341 = vmatpush1.bf16.msra.mxu1 %v2340_v9  ;;  %v2344_v16 = vpack.c.bf16 %v396_v12, %v394_v11  ;;  %v2333_v17 = vpack.c.bf16 %v308_v14, %v307_v13  ;;  %v310_v18 = vld [vmem:[%s3146_s1 + $0x20] sm:$0xff]  ;;  %s301_s25 = scalar_lea.vmem %s3145_s0, %s1936_s23  ;;  %v483_v21 = vld [vmem:[#allocation2 + $0x68] sm:$0xff]  ;;  %v3039_v47 = vsub.s32 0, %v3036_v46  ;;  %v3046_v56 = vsub.s32 1, %v3036_v46  ;;  %s305_s15 = scalar_lea.vmem %s3151_s6, %s1936_s23 }
  0x78   : > { %2343 = vmatprep.subr.bf16.mxu1 %v2342_v10  ;;  %v2336_v19 = vpack.c.bf16 %v310_v18, %v309_v15  ;;  %v482_v20 = vld [vmem:[#allocation2 + $0x58] sm:$0xff]  ;;  %v306_v22 = vld [vmem:[%s301_s25] sm:$0xff]  ;;  %v485_v25 = vld [vmem:[#allocation2 + $0x88] sm:$0xff] }
  0x79   : > { %2334 = vmatpush3.bf16.msra.mxu0 %v2333_v17  ;;  %v2347_v23 = vpack.c.bf16 %v483_v21, %v482_v20  ;;  %v484_v24 = vld [vmem:[#allocation2 + $0x78] sm:$0xff]  ;;  %v487_v28 = vld [vmem:[#allocation2 + $0xa8] sm:$0xff]  ;;  %v588_v11 = vld [vmem:[#allocation4 + $0x10] sm:$0xff] }
  0x7a   : > { %2335 = vmatprep.subr.bf16.mxu0 %v2823_v1  ;;  %v2350_v26 = vpack.c.bf16 %v485_v25, %v484_v24  ;;  %v486_v27 = vld [vmem:[#allocation2 + $0x98] sm:$0xff]  ;;  %v489_v31 = vld [vmem:[#allocation2 + $0xc8] sm:$0xff]  ;;  %v590_v12 = vld [vmem:[#allocation4 + $0x20] sm:$0xff] }
  0x7b   : > { %2345 = vmatpush1.bf16.msra.mxu1 %v2344_v16  ;;  %v2353_v29 = vpack.c.bf16 %v487_v28, %v486_v27  ;;  %v488_v30 = vld [vmem:[#allocation2 + $0xb8] sm:$0xff]  ;;  %v491_v34 = vld [vmem:[#allocation2 + $0xe8] sm:$0xff]  ;;  %v2372_v13 = vpack.c.bf16 %v590_v12, %v588_v11  ;;  %v592_v17 = vld [vmem:[#allocation4 + $0x30] sm:$0xff] }
  0x7c   : > { %v2356_v32 = vpack.c.bf16 %v489_v31, %v488_v30  ;;  %v490_v33 = vld [vmem:[#allocation2 + $0xd8] sm:$0xff]  ;;  %v493_v37 = vld [vmem:[#allocation2 + $0x108] sm:$0xff]  ;;  %v594_v18 = vld [vmem:[#allocation4 + $0x40] sm:$0xff] }
  0x7d   : > { %2337 = vmatpush3.bf16.msra.mxu0 %v2336_v19  ;;  %v2359_v35 = vpack.c.bf16 %v491_v34, %v490_v33  ;;  %v492_v36 = vld [vmem:[#allocation2 + $0xf8] sm:$0xff]  ;;  %v495_v40 = vld [vmem:[#allocation2 + $0x128] sm:$0xff]  ;;  %v2376_v19 = vpack.c.bf16 %v594_v18, %v592_v17 }
  0x7e   : > { %1940 = vmatmul.mubr.msk.f32.vlgmr.msra.gmra.mrb[0].mxu1 %vm316_vm1, %v306_v22  ;;  %2346 = vmatprep.subr.bf16.mxu0 %v2823_v1  ;;  %v2362_v38 = vpack.c.bf16 %v493_v37, %v492_v36  ;;  %v494_v39 = vld [vmem:[#allocation2 + $0x118] sm:$0xff]  ;;  %v497_v43 = vld [vmem:[#allocation2 + $0x148] sm:$0xff] }
  0x7f   : > { %675 = vmatprep.mubr.f32.mxu1 %v2822_v0  ;;  %v2365_v41 = vpack.c.bf16 %v495_v40, %v494_v39  ;;  %v496_v42 = vld [vmem:[#allocation2 + $0x138] sm:$0xff]  ;;  %v398_v48 = vld [vmem:[#allocation2] ss:$8 sm:$0x3]  ;;  %v498_v58 = vld [vmem:[#allocation2 + $0x9] ss:$0 sm:$0xff] }
  0x80   : > { %2179 = vmatmul.mubr.msk.f32.vlgmr.msra.gmra.mrb[0].mxu0 %vm316_vm1, %v306_v22  ;;  %v2368_v44 = vpack.c.bf16 %v497_v43, %v496_v42  ;;  %v403_v49 = vrot.slane %v398_v48, %v3039_v47  ;;  %v407_v57 = vrot.slane %v398_v48, %v3046_v56  ;;  %v589_v8 = vld [vmem:[#allocation4 + $0x18] sm:$0xff]  ;;  %v591_v9 = vld [vmem:[#allocation4 + $0x28] sm:$0xff] }
  0x81   : > { %2348 = vmatpush3.bf16.msra.mxu0 %v2347_v23  ;;  %2213 = vmatprep.mubr.msk.f32.mxu0 %vm2824_vm0, %v2822_v0  ;;  %v2370_v10 = vpack.c.bf16 %v591_v9, %v589_v8  ;;  %v593_v14 = vld [vmem:[#allocation4 + $0x38] sm:$0xff]  ;;  %v595_v15 = vld [vmem:[#allocation4 + $0x48] sm:$0xff] }
  0x82   : > { %2349 = vmatprep.subr.bf16.mxu0 %v2823_v1  ;;  %v2374_v16 = vpack.c.bf16 %v595_v15, %v593_v14  ;;  %v584_v24 = vld [vmem:[#allocation2 + $0xa] ss:$0 sm:$0xff]  ;;  %v684_v27 = vld [vmem:[#allocation4 + $0x68] sm:$0xff]  ;;  %v586_v28 = vld [vmem:[#allocation2 + $0xb] ss:$0 sm:$0xff] }
  0x83   : > { %2371 = vmatprep.subr.bf16.mxu1 %v2370_v10  ;;  %v686_v33 = vld [vmem:[#allocation4 + $0x88] sm:$0xff]  ;;  %v789_v14 = vld [vmem:[#allocation6 + $0x50] sm:$0xff] }
  0x84   : > { %2373 = vmatpush1.bf16.msra.mxu1 %v2372_v13  ;;  %v688_v36 = vld [vmem:[#allocation4 + $0xa8] sm:$0xff] }
  0x85   : > { %2351 = vmatpush3.bf16.msra.mxu0 %v2350_v26  ;;  %2375 = vmatprep.subr.bf16.mxu1 %v2374_v16  ;;  %v683_v26 = vld [vmem:[#allocation4 + $0x58] sm:$0xff]  ;;  %v690_v39 = vld [vmem:[#allocation4 + $0xc8] sm:$0xff]  ;;  %v793_v16 = vld [vmem:[#allocation6 + $0x70] sm:$0xff] }
  0x86   : > { %2352 = vmatprep.subr.bf16.mxu0 %v2823_v1  ;;  %v2379_v30 = vpack.c.bf16 %v684_v27, %v683_v26  ;;  %v692_v42 = vld [vmem:[#allocation4 + $0xe8] sm:$0xff]  ;;  %v807_v26 = vld [vmem:[#allocation6 + $0xe0] sm:$0xff]  ;;  %v816_v27 = vld [vmem:[#allocation6 + $0x128] sm:$0xff] }
  0x87   : > { %v694_v45 = vld [vmem:[#allocation4 + $0x108] sm:$0xff] }
  0x88   : > { %2377 = vmatpush1.bf16.msra.mxu1 %v2376_v19  ;;  %v798_v15 = vld [vmem:[#allocation6 + $0x98] sm:$0xff]  ;;  %v788_v19 = vld [vmem:[#allocation6 + $0x48] sm:$0xff] }
  0x89   : > { %2354 = vmatpush3.bf16.msra.mxu0 %v2353_v29  ;;  %2378 = vmatprep.subr.bf16.mxu1 %v2823_v1  ;;  %v2402_v17 = vpack.c.bf16 %v798_v15, %v789_v14  ;;  %v802_v18 = vld [vmem:[#allocation6 + $0xb8] sm:$0xff]  ;;  %v813_v14 = vld [vmem:[#allocation6 + $0x110] sm:$0xff] }
  0x8a   : > { %2355 = vmatprep.subr.bf16.mxu0 %v2823_v1 }
  0x8d   : > { %2357 = vmatpush3.bf16.msra.mxu0 %v2356_v32  ;;  %v685_v32 = vld [vmem:[#allocation4 + $0x78] sm:$0xff] }
  0x8e   : > { %2358 = vmatprep.subr.bf16.mxu0 %v2823_v1  ;;  %v2382_v34 = vpack.c.bf16 %v686_v33, %v685_v32  ;;  %v815_v32 = vld [vmem:[#allocation6 + $0x120] sm:$0xff] }
  0x91   : > { %2360 = vmatpush3.bf16.msra.mxu0 %v2359_v35  ;;  %v687_v35 = vld [vmem:[#allocation4 + $0x98] sm:$0xff] }
  0x92   : > { %2361 = vmatprep.subr.bf16.mxu0 %v2823_v1  ;;  %v2385_v37 = vpack.c.bf16 %v688_v36, %v687_v35  ;;  %v810_v35 = vld [vmem:[#allocation6 + $0xf8] sm:$0xff]  ;;  %v819_v36 = vld [vmem:[#allocation6 + $0x140] sm:$0xff] }
  0x95   : > { %2363 = vmatpush3.bf16.msra.mxu0 %v2362_v38  ;;  %v689_v38 = vld [vmem:[#allocation4 + $0xb8] sm:$0xff] }
  0x96   : > { %2364 = vmatprep.subr.bf16.mxu0 %v2823_v1  ;;  %v2388_v40 = vpack.c.bf16 %v690_v39, %v689_v38  ;;  %v791_v38 = vld [vmem:[#allocation6 + $0x60] sm:$0xff]  ;;  %v800_v39 = vld [vmem:[#allocation6 + $0xa8] sm:$0xff] }
  0x99   : > { %2366 = vmatpush3.bf16.msra.mxu0 %v2365_v41  ;;  %v691_v41 = vld [vmem:[#allocation4 + $0xd8] sm:$0xff] }
  0x9a   : > { %2367 = vmatprep.subr.bf16.mxu0 %v2823_v1  ;;  %v2391_v43 = vpack.c.bf16 %v692_v42, %v691_v41 }
  0x9d   : > { %2369 = vmatpush3.bf16.msra.mxu0 %v2368_v44  ;;  %v693_v44 = vld [vmem:[#allocation4 + $0xf8] sm:$0xff] }
  0x9e   : > { %v2394_v48 = vpack.c.bf16 %v694_v45, %v693_v44  ;;  %2403 = vmatprep.subr.bf16.mxu0 %v2402_v17  ;;  %v784_v45 = vld [vmem:[#allocation4 + $0xa] ss:$0 sm:$0xff]  ;;  %v1273_v17 = vld [vmem:[#allocation7 + $0x188] sm:$0xff] }
 0x151   : > { %v476_v50 = vpop.f32.mrb[0].mxu1 }
 0x152   : > { %v477_v51 = vadd.f32 %v476_v50, %v403_v49  ;;  %v478_v52 = vpop.f32.mrb[1].mxu1  ;;  %v695_v49 = vld [vmem:[#allocation4 + $0x118] sm:$0xff]  ;;  %v696_v50 = vld [vmem:[#allocation4 + $0x128] sm:$0xff] }
 0x153   : > { %v3042_v53 = vpop.f32.mrb[0].mxu0  ;;  %v479_v60 = vadd.f32 %v478_v52, %v407_v57  ;;  %v697_v52 = vld [vmem:[#allocation4 + $0x138] sm:$0xff]  ;;  %v596_v57 = vld [vmem:[#allocation4] ss:$8 sm:$0x3] }
 0x154   : > { %v481_v54 = vmax.f32 %v477_v51, 0.0  ;;  %v2180_v55 = vpop.f32.mrb[1].mxu0  ;;  %v2397_v51 = vpack.c.bf16 %v696_v50, %v695_v49  ;;  %v799_v50 = vld [vmem:[#allocation6 + $0xa0] sm:$0xff] }
 0x156   : > { %2214 = vmatmul.mubr.f32.vlgmr.msra.gmra.mrb[2].mxu0 %v481_v54  ;;  %v698_v54 = vld [vmem:[#allocation4 + $0x148] sm:$0xff] }
 0x157   : > { %943 = vmatprep.mubr.f32.mxu0 %v2822_v0  ;;  %v2400_v55 = vpack.c.bf16 %v698_v54, %v697_v52  ;;  %v805_v52 = vld [vmem:[#allocation6 + $0xd0] sm:$0xff]  ;;  %v786_v54 = vld [vmem:[#allocation4 + $0xb] ss:$0 sm:$0xff] }
 0x229   : > { %v565_v59 = vpop.f32.mrb[2].mxu0 }
 0x22a   : > { %v566_v61 = vadd.f32 %v565_v59, %v498_v58  ;;  %v2215_v62 = vpop.f32.mrb[3].mxu0  ;;  %v601_v58 = vrot.slane %v596_v57, %v3039_v47 }
 0x22c   : > { %v569_v63 = vadd.f32 %v566_v61, %v479_v60 }
 0x22e   : > { %v570_v2 = vsel %vm316_vm1, %v569_v63, 0.0 }
 0x22f   : > { %571 = vadd.xlane.f32.xlu0 %v570_v2  ;;  %v699_v2 = vld [vmem:[#allocation4 + $0x9] ss:$0 sm:$0xff] }
 0x2bc   : > { %v572_v3 = vpop.xlane.xlu0 %571 }
 0x2bd   : > { %v574_v4 = vmul.f32 0.03125, %v572_v3 }
 0x2bf   : > { %v575_v5 = vsub.f32 %v569_v63, %v574_v4  ;;  %v605_v63 = vrot.slane %v596_v57, %v3046_v56  ;;  %v818_v57 = vld [vmem:[#allocation6 + $0x138] sm:$0xff] }
 0x2c1   : > { %v576_v6 = vmul.f32 %v575_v5, %v575_v5 }
 0x2c3   : > { %v577_v7 = vsel %vm316_vm1, %v576_v6, 0.0 }
 0x2c4   : > { %578 = vadd.xlane.f32.xlu0 %v577_v7 }
 0x351   : > { %v579_v20 = vpop.xlane.xlu0 %578 }
 0x352   : > { %v580_v21 = vmul.f32 0.03125, %v579_v20  ;;  %v797_v20 = vld [vmem:[#allocation6 + $0x90] sm:$0xff] }
 0x354   : > { %v581_v22 = vadd.f32 1e-05, %v580_v21  ;;  %v2418_v21 = vpack.c.bf16 %v802_v18, %v793_v16  ;;  %v822_v16 = vld [vmem:[#allocation6 + $0x158] sm:$0xff] }
 0x355   : > { %v1274_v18 = vld [vmem:[#allocation7 + $0x190] sm:$0xff] }
 0x356   : > { %2674 = vrsqrt.f32 %v581_v22  ;;  %v2404_v22 = vpack.c.bf16 %v797_v20, %v788_v19  ;;  %v1291_v19 = vld [vmem:[#allocation7 + $0x218] sm:$0xff]  ;;  %v1292_v20 = vld [vmem:[#allocation7 + $0x220] sm:$0xff] }
 0x358   : > { %2405 = vmatpush1.bf16.msra.mxu0 %v2404_v22  ;;  %v2430_v22 = vpack.c.bf16 %v822_v16, %v813_v14  ;;  %v1265_v14 = vld [vmem:[#allocation7 + $0x148] sm:$0xff] }
 0x360   : > { %v2675_v23 = vpop.eup %2674 }
 0x361   : > { %v583_v25 = vmul.f32 %v2675_v23, %v575_v5  ;;  %v792_v23 = vld [vmem:[#allocation6 + $0x68] sm:$0xff] }
 0x363   : > { %v585_v29 = vmul.f32 %v584_v24, %v583_v25  ;;  %v801_v24 = vld [vmem:[#allocation6 + $0xb0] sm:$0xff] }
 0x364   : > { %v2420_v25 = vpack.c.bf16 %v801_v24, %v792_v23  ;;  %v812_v23 = vld [vmem:[#allocation6 + $0x108] sm:$0xff]  ;;  %v821_v24 = vld [vmem:[#allocation6 + $0x150] sm:$0xff] }
 0x365   : > { %v587_v31 = vadd.f32 %v586_v28, %v585_v29  ;;  %v811_v28 = vld [vmem:[#allocation6 + $0x100] sm:$0xff]  ;;  %v2406_v29 = vpack.c.bf16 %v816_v27, %v807_v26  ;;  %v2474_v26 = vpack.c.bf16 %v1274_v18, %v1273_v17  ;;  %v1258_v27 = vld [vmem:[#allocation7 + $0x110] sm:$0xff]  ;;  %v1249_v18 = vld [vmem:[#allocation7 + $0xc8] sm:$0xff] }
 0x367   : > { %1941 = vmatmul.mubr.msk.f32.vlgmr.msra.gmra.mrb[2].mxu1 %vm316_vm1, %v587_v31  ;;  %v806_v31 = vld [vmem:[#allocation6 + $0xd8] sm:$0xff]  ;;  %2407 = vmatprep.subr.bf16.mxu0 %v2406_v29  ;;  %v1275_v29 = vld [vmem:[#allocation7 + $0x198] sm:$0xff] }
 0x368   : > { %2380 = vmatpush3.bf16.msra.mxu1 %v2379_v30  ;;  %2248 = vmatprep.mubr.msk.f32.mxu1 %vm2824_vm0, %v2822_v0  ;;  %v820_v30 = vld [vmem:[#allocation6 + $0x148] sm:$0xff] }
 0x369   : > { %2381 = vmatprep.subr.bf16.mxu1 %v2823_v1  ;;  %v2422_v33 = vpack.c.bf16 %v820_v30, %v811_v28  ;;  %v2476_v28 = vpack.c.bf16 %v1292_v20, %v1291_v19  ;;  %v1276_v30 = vld [vmem:[#allocation7 + $0x1a0] sm:$0xff]  ;;  %v1250_v19 = vld [vmem:[#allocation7 + $0xd0] sm:$0xff]  ;;  %v1267_v20 = vld [vmem:[#allocation7 + $0x158] sm:$0xff] }
 0x36c   : > { %2383 = vmatpush3.bf16.msra.mxu1 %v2382_v34  ;;  %v2408_v34 = vpack.c.bf16 %v815_v32, %v806_v31  ;;  %v1293_v31 = vld [vmem:[#allocation7 + $0x228] sm:$0xff]  ;;  %v1294_v32 = vld [vmem:[#allocation7 + $0x230] sm:$0xff] }
 0x36d   : > { %2384 = vmatprep.subr.bf16.mxu1 %v2823_v1 }
 0x36e   : > { %2409 = vmatpush1.bf16.msra.mxu0 %v2408_v34 }
 0x370   : > { %2386 = vmatpush3.bf16.msra.mxu1 %v2385_v37  ;;  %v2424_v37 = vpack.c.bf16 %v819_v36, %v810_v35  ;;  %v1241_v35 = vld [vmem:[#allocation7 + $0x88] sm:$0xff]  ;;  %v1242_v36 = vld [vmem:[#allocation7 + $0x90] sm:$0xff] }
 0x371   : > { %2387 = vmatprep.subr.bf16.mxu1 %v2823_v1 }
 0x374   : > { %2389 = vmatpush3.bf16.msra.mxu1 %v2388_v40  ;;  %v2410_v40 = vpack.c.bf16 %v800_v39, %v791_v38  ;;  %v2478_v38 = vpack.c.bf16 %v1276_v30, %v1275_v29  ;;  %v1260_v39 = vld [vmem:[#allocation7 + $0x120] sm:$0xff]  ;;  %v1253_v30 = vld [vmem:[#allocation7 + $0xe8] sm:$0xff] }
 0x375   : > { %2390 = vmatprep.subr.bf16.mxu1 %v2823_v1 }
 0x376   : > { %2411 = vmatprep.subr.bf16.mxu0 %v2410_v40  ;;  %v2480_v40 = vpack.c.bf16 %v1294_v32, %v1293_v31  ;;  %v1254_v31 = vld [vmem:[#allocation7 + $0xf0] sm:$0xff] }
 0x377   : > { %v2466_v32 = vpack.c.bf16 %v1254_v31, %v1253_v30  ;;  %v1308_v30 = vld [vmem:[#allocation7 + $0x2a0] sm:$0xff] }
 0x378   : > { %2392 = vmatpush3.bf16.msra.mxu1 %v2391_v43 }
 0x379   : > { %2393 = vmatprep.subr.bf16.mxu1 %v2823_v1 }
 0x37c   : > { %2395 = vmatpush3.bf16.msra.mxu1 %v2394_v48  ;;  %v790_v48 = vld [vmem:[#allocation6 + $0x58] sm:$0xff] }
 0x37d   : > { %2396 = vmatprep.subr.bf16.mxu1 %v2823_v1 }
 0x380   : > { %2398 = vmatpush3.bf16.msra.mxu1 %v2397_v51  ;;  %v796_v51 = vld [vmem:[#allocation6 + $0x88] sm:$0xff] }
 0x381   : > { %2399 = vmatprep.subr.bf16.mxu1 %v2823_v1 }
 0x384   : > { %2401 = vmatpush3.bf16.msra.mxu1 %v2400_v55  ;;  %v809_v55 = vld [vmem:[#allocation6 + $0xf0] sm:$0xff] }
 0x385   : > { %2419 = vmatprep.subr.bf16.mxu1 %v2418_v21 }
 0x43a   : > { %v677_v59 = vpop.f32.mrb[2].mxu1 }
 0x43b   : > { %v678_v60 = vadd.f32 %v677_v59, %v601_v58  ;;  %v679_v61 = vpop.f32.mrb[3].mxu1  ;;  %v2412_v59 = vpack.c.bf16 %v799_v50, %v790_v48  ;;  %v1244_v50 = vld [vmem:[#allocation7 + $0xa0] sm:$0xff] }
 0x43c   : > { %v680_v4 = vadd.f32 %v679_v61, %v605_v63  ;;  %v808_v61 = vld [vmem:[#allocation6 + $0xe8] sm:$0xff] }
 0x43d   : > { %v682_v62 = vmax.f32 %v678_v60, 0.0  ;;  %v2435_v60 = vpack.c.bf16 %v805_v52, %v796_v51  ;;  %v1261_v51 = vld [vmem:[#allocation7 + $0x128] sm:$0xff] }
 0x43f   : > { %2249 = vmatmul.mubr.f32.vlgmr.msra.gmra.mrb[4].mxu1 %v682_v62  ;;  %v817_v62 = vld [vmem:[#allocation6 + $0x130] sm:$0xff] }
 0x440   : > { %1085 = vmatprep.mubr.f32.mxu1 %v2822_v0  ;;  %2421 = vmatpush1.bf16.msra.mxu1 %v2420_v25  ;;  %v1257_v25 = vld [vmem:[#allocation7 + $0x108] sm:$0xff] }
 0x441   : > { %2423 = vmatprep.subr.bf16.mxu1 %v2422_v33  ;;  %v2432_v33 = vpack.c.bf16 %v821_v24, %v812_v23  ;;  %v2440_v34 = vpack.c.bf16 %v1258_v27, %v1257_v25  ;;  %v1251_v24 = vld [vmem:[#allocation7 + $0xd8] sm:$0xff]  ;;  %v1252_v25 = vld [vmem:[#allocation7 + $0xe0] sm:$0xff]  ;;  %v1270_v27 = vld [vmem:[#allocation7 + $0x170] sm:$0xff] }
 0x444   : > { %2425 = vmatpush1.bf16.msra.mxu1 %v2424_v37  ;;  %v1259_v37 = vld [vmem:[#allocation7 + $0x118] sm:$0xff] }
 0x445   : > { %2434 = vmatprep.subr.bf16.mxu1 %v2823_v1  ;;  %v2444_v48 = vpack.c.bf16 %v1260_v39, %v1259_v37  ;;  %v1272_v37 = vld [vmem:[#allocation7 + $0x180] sm:$0xff] }
 0x512   : > { %v766_v3 = vpop.f32.mrb[4].mxu1 }
 0x513   : > { %v767_v5 = vadd.f32 %v766_v3, %v699_v2  ;;  %v2250_v6 = vpop.f32.mrb[5].mxu1  ;;  %v2414_v2 = vpack.c.bf16 %v818_v57, %v809_v55  ;;  %v814_v3 = vld [vmem:[#allocation6 + $0x118] sm:$0xff]  ;;  %v1279_v57 = vld [vmem:[#allocation7 + $0x1b8] sm:$0xff] }
 0x514   : > { %v804_v6 = vld [vmem:[#allocation6 + $0xc8] sm:$0xff] }
 0x515   : > { %v770_v7 = vadd.f32 %v767_v5, %v680_v4  ;;  %v823_v4 = vld [vmem:[#allocation6 + $0x160] sm:$0xff] }
 0x516   : > { %v795_v5 = vld [vmem:[#allocation6 + $0x80] sm:$0xff] }
 0x517   : > { %v771_v8 = vsel %vm316_vm1, %v770_v7, 0.0 }
 0x518   : > { %772 = vadd.xlane.f32.xlu1 %v771_v8  ;;  %v1290_v8 = vld [vmem:[#allocation7 + $0x210] sm:$0xff] }
 0x5a5   : > { %v773_v9 = vpop.xlane.xlu1 %772 }
 0x5a6   : > { %v774_v10 = vmul.f32 0.03125, %v773_v9  ;;  %v2416_v9 = vpack.c.bf16 %v817_v62, %v808_v61 }
 0x5a8   : > { %v775_v11 = vsub.f32 %v770_v7, %v774_v10  ;;  %v1289_v7 = vld [vmem:[#allocation7 + $0x208] sm:$0xff]  ;;  %v2438_v10 = vpack.c.bf16 %v823_v4, %v814_v3  ;;  %v1246_v3 = vld [vmem:[#allocation7 + $0xb0] sm:$0xff]  ;;  %v1263_v4 = vld [vmem:[#allocation7 + $0x138] sm:$0xff] }
 0x5a9   : > { %v2472_v15 = vpack.c.bf16 %v1290_v8, %v1289_v7  ;;  %v1281_v8 = vld [vmem:[#allocation7 + $0x1c8] sm:$0xff] }
 0x5aa   : > { %v776_v12 = vmul.f32 %v775_v11, %v775_v11 }
 0x5ac   : > { %v777_v13 = vsel %vm316_vm1, %v776_v12, 0.0  ;;  %v794_v12 = vld [vmem:[#allocation6 + $0x78] sm:$0xff] }
 0x5ad   : > { %778 = vadd.xlane.f32.xlu1 %v777_v13  ;;  %v803_v13 = vld [vmem:[#allocation6 + $0xc0] sm:$0xff] }
 0x5ae   : > { %v2428_v21 = vpack.c.bf16 %v803_v13, %v794_v12  ;;  %v1248_v12 = vld [vmem:[#allocation7 + $0xc0] sm:$0xff] }
 0x63a   : > { %v779_v41 = vpop.xlane.xlu1 %778 }
 0x63b   : > { %v780_v42 = vmul.f32 0.03125, %v779_v41  ;;  %v1277_v41 = vld [vmem:[#allocation7 + $0x1a8] sm:$0xff] }
 0x63d   : > { %v781_v43 = vadd.f32 1e-05, %v780_v42  ;;  %v1278_v42 = vld [vmem:[#allocation7 + $0x1b0] sm:$0xff] }
 0x63e   : > { %v2482_v52 = vpack.c.bf16 %v1278_v42, %v1277_v41  ;;  %v1255_v41 = vld [vmem:[#allocation7 + $0xf8] sm:$0xff]  ;;  %v1256_v42 = vld [vmem:[#allocation7 + $0x100] sm:$0xff] }
 0x63f   : > { %2676 = vrsqrt.f32 %v781_v43  ;;  %v1295_v43 = vld [vmem:[#allocation7 + $0x238] sm:$0xff] }
 0x649   : > { %v2677_v44 = vpop.eup %2676 }
 0x64a   : > { %v783_v49 = vmul.f32 %v2677_v44, %v775_v11  ;;  %v2426_v11 = vpack.c.bf16 %v804_v6, %v795_v5  ;;  %v1296_v44 = vld [vmem:[#allocation7 + $0x240] sm:$0xff] }
 0x64b   : > { %v2484_v55 = vpack.c.bf16 %v1296_v44, %v1295_v43  ;;  %v1264_v6 = vld [vmem:[#allocation7 + $0x140] sm:$0xff]  ;;  %v2470_v44 = vpack.c.bf16 %v1256_v42, %v1255_v41 }
 0x64c   : > { %v785_v58 = vmul.f32 %v784_v45, %v783_v49  ;;  %v2442_v45 = vpack.c.bf16 %v1242_v36, %v1241_v35  ;;  %v1243_v49 = vld [vmem:[#allocation7 + $0x98] sm:$0xff] }
 0x64d   : > { %v2446_v61 = vpack.c.bf16 %v1244_v50, %v1243_v49  ;;  %v1271_v36 = vld [vmem:[#allocation7 + $0x178] sm:$0xff]  ;;  %v1285_v50 = vld [vmem:[#allocation7 + $0x1e8] sm:$0xff] }
 0x64e   : > { %v3068_v63 = vadd.f32 %v786_v54, %v785_v58  ;;  %v1262_v54 = vld [vmem:[#allocation7 + $0x130] sm:$0xff]  ;;  %v1280_v58 = vld [vmem:[#allocation7 + $0x1c0] sm:$0xff]  ;;  %v2468_v39 = vpack.c.bf16 %v1272_v37, %v1271_v36 }
 0x64f   : > { %v2448_v62 = vpack.c.bf16 %v1262_v54, %v1261_v51  ;;  %v2486_v5 = vpack.c.bf16 %v1280_v58, %v1279_v57  ;;  %v1286_v51 = vld [vmem:[#allocation7 + $0x1f0] sm:$0xff]  ;;  %v1303_v58 = vld [vmem:[#allocation7 + $0x278] sm:$0xff] }
 0x650   : > { %1942 = vmatmul.mubr.msk.f32.vlgmr.msra.gmra.mrb[4].mxu0 %vm316_vm1, %v3068_v63  ;;  %1944 = vmatmul.mubr.msk.f32.vlgmr.msra.gmra.mrb[6].mxu1 %vm316_vm1, %v3068_v63  ;;  %v2498_v54 = vpack.c.bf16 %v1286_v51, %v1285_v50  ;;  %v861_v50 = vsub.s32 7, %v3036_v46  ;;  %v1356_v51 = vld [vmem:[#allocation7 + $0x420] sm:$0xff] }
 0x651   : > { %2413 = vmatpush1.bf16.msra.mxu0 %v2412_v59  ;;  %2436 = vmatpush3.bf16.msra.mxu1 %v2435_v60  ;;  %v1297_v59 = vld [vmem:[#allocation7 + $0x248] sm:$0xff]  ;;  %v1298_v60 = vld [vmem:[#allocation7 + $0x250] sm:$0xff] }
 0x652   : > { %2415 = vmatprep.subr.bf16.mxu0 %v2414_v2  ;;  %2437 = vmatprep.subr.bf16.mxu1 %v2823_v1  ;;  %v1245_v2 = vld [vmem:[#allocation7 + $0xa8] sm:$0xff]  ;;  %v2488_v7 = vpack.c.bf16 %v1298_v60, %v1297_v59  ;;  %v1304_v59 = vld [vmem:[#allocation7 + $0x280] sm:$0xff] }
 0x653   : > { %1014 = vmatprep.mubr.f32.mxu0 %v2822_v0  ;;  %2259 = vmatprep.mubr.msk.f32.mxu1 %vm2824_vm0, %v2822_v0  ;;  %v2500_v60 = vpack.c.bf16 %v1304_v59, %v1303_v58  ;;  %v1339_v59 = vld [vmem:[#allocation7 + $0x398] sm:$0xff] }
 0x655   : > { %2417 = vmatpush1.bf16.msra.mxu0 %v2416_v9  ;;  %2439 = vmatpush3.bf16.msra.mxu1 %v2438_v10  ;;  %v1282_v9 = vld [vmem:[#allocation7 + $0x1d0] sm:$0xff]  ;;  %v2450_v10 = vpack.c.bf16 %v1246_v3, %v1245_v2  ;;  %v1353_v3 = vld [vmem:[#allocation7 + $0x408] sm:$0xff] }
 0x656   : > { %2427 = vmatprep.subr.bf16.mxu0 %v2426_v11  ;;  %2473 = vmatprep.subr.bf16.mxu1 %v2472_v15  ;;  %v1247_v11 = vld [vmem:[#allocation7 + $0xb8] sm:$0xff]  ;;  %v2490_v13 = vpack.c.bf16 %v1282_v9, %v1281_v8  ;;  %v1266_v15 = vld [vmem:[#allocation7 + $0x150] sm:$0xff]  ;;  %v853_v9 = vsub.s32 5, %v3036_v46 }
 0x657   : > { %v2454_v16 = vpack.c.bf16 %v1248_v12, %v1247_v11  ;;  %v2456_v17 = vpack.c.bf16 %v1266_v15, %v1265_v14 }
 0x658   : > { %1943 = vmatmul.mubr.msk.f32.vlgmr.msra.gmra.mrb[6].mxu0 %vm316_vm1, %v3068_v63  ;;  %2260 = vmatmul.mubr.msk.f32.vlgmr.msra.gmra.mrb[8].mxu1 %vm316_vm1, %v3068_v63 }
 0x659   : > { %2429 = vmatpush1.bf16.msra.mxu0 %v2428_v21  ;;  %1156 = vmatprep.mubr.f32.mxu0 %v2822_v0  ;;  %v1268_v21 = vld [vmem:[#allocation7 + $0x160] sm:$0xff] }
 0x65a   : > { %2431 = vmatprep.subr.bf16.mxu0 %v2430_v22  ;;  %2475 = vmatpush3.bf16.msra.mxu1 %v2474_v26  ;;  %v2458_v22 = vpack.c.bf16 %v1250_v19, %v1249_v18  ;;  %v2460_v23 = vpack.c.bf16 %v1268_v21, %v1267_v20  ;;  %v1269_v26 = vld [vmem:[#allocation7 + $0x168] sm:$0xff]  ;;  %v1306_v19 = vld [vmem:[#allocation7 + $0x290] sm:$0xff] }
 0x65b   : > { %2477 = vmatprep.subr.bf16.mxu1 %v2476_v28  ;;  %v2462_v28 = vpack.c.bf16 %v1252_v25, %v1251_v24  ;;  %v2464_v29 = vpack.c.bf16 %v1270_v27, %v1269_v26  ;;  %v1305_v18 = vld [vmem:[#allocation7 + $0x288] sm:$0xff]  ;;  %v1324_v24 = vld [vmem:[#allocation7 + $0x320] sm:$0xff] }
 0x65d   : > { %2433 = vmatpush1.bf16.msra.mxu0 %v2432_v33  ;;  %v1299_v33 = vld [vmem:[#allocation7 + $0x258] sm:$0xff] }
 0x65e   : > { %2441 = vmatprep.subr.bf16.mxu0 %v2440_v34  ;;  %2479 = vmatpush3.bf16.msra.mxu1 %v2478_v38  ;;  %v1300_v34 = vld [vmem:[#allocation7 + $0x260] sm:$0xff]  ;;  %v1283_v38 = vld [vmem:[#allocation7 + $0x1d8] sm:$0xff] }
 0x65f   : > { %2481 = vmatprep.subr.bf16.mxu1 %v2480_v40  ;;  %v2492_v35 = vpack.c.bf16 %v1300_v34, %v1299_v33  ;;  %v1284_v40 = vld [vmem:[#allocation7 + $0x1e0] sm:$0xff]  ;;  %v1325_v33 = vld [vmem:[#allocation7 + $0x328] sm:$0xff]  ;;  %v1326_v34 = vld [vmem:[#allocation7 + $0x330] sm:$0xff] }
 0x660   : > { %1945 = vmatmul.mubr.msk.f32.vlgmr.msra.gmra.mrb[8].mxu0 %vm316_vm1, %v3068_v63  ;;  %v2452_v63 = vpack.c.bf16 %v1264_v6, %v1263_v4  ;;  %v2494_v43 = vpack.c.bf16 %v1284_v40, %v1283_v38  ;;  %v1354_v4 = vld [vmem:[#allocation7 + $0x410] sm:$0xff]  ;;  %v1337_v38 = vld [vmem:[#allocation7 + $0x388] sm:$0xff] }
 0x661   : > { %2443 = vmatpush3.bf16.msra.mxu0 %v2442_v45  ;;  %v1301_v45 = vld [vmem:[#allocation7 + $0x268] sm:$0xff] }
 0x662   : > { %2445 = vmatprep.subr.bf16.mxu0 %v2444_v48  ;;  %2483 = vmatpush3.bf16.msra.mxu1 %v2482_v52  ;;  %v1302_v48 = vld [vmem:[#allocation7 + $0x270] sm:$0xff]  ;;  %v1321_v52 = vld [vmem:[#allocation7 + $0x308] sm:$0xff] }
 0x663   : > { %2485 = vmatprep.subr.bf16.mxu1 %v2484_v55  ;;  %v2496_v49 = vpack.c.bf16 %v1302_v48, %v1301_v45  ;;  %v1322_v55 = vld [vmem:[#allocation7 + $0x310] sm:$0xff]  ;;  %v1355_v48 = vld [vmem:[#allocation7 + $0x418] sm:$0xff] }
 0x664   : > { %v2504_v57 = vpack.c.bf16 %v1322_v55, %v1321_v52  ;;  %v824_v6 = vld [vmem:[#allocation6] ss:$8 sm:$0xf] }
 0x665   : > { %2447 = vmatpush3.bf16.msra.mxu0 %v2446_v61  ;;  %v1287_v61 = vld [vmem:[#allocation7 + $0x1f8] sm:$0xff]  ;;  %v1310_v45 = vld [vmem:[#allocation7 + $0x2b0] sm:$0xff] }
 0x666   : > { %2449 = vmatprep.subr.bf16.mxu0 %v2448_v62  ;;  %2487 = vmatpush3.bf16.msra.mxu1 %v2486_v5  ;;  %v1288_v62 = vld [vmem:[#allocation7 + $0x200] sm:$0xff]  ;;  %v2536_v5 = vpack.c.bf16 %v1354_v4, %v1353_v3  ;;  %v1327_v52 = vld [vmem:[#allocation7 + $0x338] sm:$0xff] }
 0x667   : > { %2489 = vmatprep.subr.bf16.mxu1 %v2488_v7  ;;  %v2502_v2 = vpack.c.bf16 %v1288_v62, %v1287_v61  ;;  %v825_v7 = vld [vmem:[#allocation6] ss:$8 sm:$0xf0]  ;;  %v2540_v62 = vpack.c.bf16 %v1356_v51, %v1355_v48 }
 0x668   : > { %v3085_v8 = vor.u32 %v825_v7, %v824_v6  ;;  %v1311_v3 = vld [vmem:[#allocation7 + $0x2b8] sm:$0xff]  ;;  %v1312_v4 = vld [vmem:[#allocation7 + $0x2c0] sm:$0xff]  ;;  %v1358_v7 = vld [vmem:[#allocation7 + $0x430] sm:$0xff] }
 0x669   : > { %2451 = vmatpush3.bf16.msra.mxu0 %v2450_v10  ;;  %v1317_v48 = vld [vmem:[#allocation7 + $0x2e8] sm:$0xff]  ;;  %v1364_v51 = vld [vmem:[#allocation7 + $0x460] sm:$0xff] }
 0x66a   : > { %2453 = vmatprep.subr.bf16.mxu0 %v2452_v63  ;;  %2491 = vmatpush3.bf16.msra.mxu1 %v2490_v13  ;;  %v834_v10 = vrot.slane %v3085_v8, %v3039_v47  ;;  %v838_v63 = vrot.slane %v3085_v8, %v3046_v56  ;;  %v854_v11 = vrot.slane %v3085_v8, %v853_v9  ;;  %v1329_v9 = vld [vmem:[#allocation7 + $0x348] sm:$0xff] }
 0x66b   : > { %2493 = vmatprep.subr.bf16.mxu1 %v2492_v35  ;;  %v2506_v56 = vpack.c.bf16 %v1306_v19, %v1305_v18  ;;  %v862_v6 = vrot.slane %v3085_v8, %v861_v50  ;;  %v1313_v19 = vld [vmem:[#allocation7 + $0x2c8] sm:$0xff]  ;;  %v1363_v50 = vld [vmem:[#allocation7 + $0x458] sm:$0xff] }
 0x66d   : > { %2455 = vmatpush3.bf16.msra.mxu0 %v2454_v16 }
 0x66e   : > { %2457 = vmatprep.subr.bf16.mxu0 %v2456_v17  ;;  %2495 = vmatpush3.bf16.msra.mxu1 %v2494_v43  ;;  %v841_v17 = vsub.s32 2, %v3036_v46  ;;  %v2512_v43 = vpack.c.bf16 %v1326_v34, %v1325_v33  ;;  %v1316_v33 = vld [vmem:[#allocation7 + $0x2e0] sm:$0xff]  ;;  %v1361_v34 = vld [vmem:[#allocation7 + $0x448] sm:$0xff] }
 0x66f   : > { %2497 = vmatprep.subr.bf16.mxu1 %v2496_v49 }
 0x670   : > { %v842_v27 = vrot.slane %v3085_v8, %v841_v17 }
 0x671   : > { %2459 = vmatpush3.bf16.msra.mxu0 %v2458_v22  ;;  %v845_v22 = vsub.s32 3, %v3036_v46 }
 0x672   : > { %2461 = vmatprep.subr.bf16.mxu0 %v2460_v23  ;;  %2499 = vmatpush3.bf16.msra.mxu1 %v2498_v54  ;;  %v1323_v23 = vld [vmem:[#allocation7 + $0x318] sm:$0xff]  ;;  %v1328_v54 = vld [vmem:[#allocation7 + $0x340] sm:$0xff] }
 0x673   : > { %2501 = vmatprep.subr.bf16.mxu1 %v2500_v60  ;;  %v1340_v60 = vld [vmem:[#allocation7 + $0x3a0] sm:$0xff] }
 0x675   : > { %2463 = vmatpush3.bf16.msra.mxu0 %v2462_v28  ;;  %v2508_v28 = vpack.c.bf16 %v1324_v24, %v1323_v23  ;;  %v1360_v23 = vld [vmem:[#allocation7 + $0x440] sm:$0xff]  ;;  %v1331_v24 = vld [vmem:[#allocation7 + $0x358] sm:$0xff] }
 0x676   : > { %2465 = vmatprep.subr.bf16.mxu0 %v2464_v29  ;;  %2503 = vmatpush3.bf16.msra.mxu1 %v2502_v2  ;;  %v1307_v29 = vld [vmem:[#allocation7 + $0x298] sm:$0xff]  ;;  %v2516_v2 = vpack.c.bf16 %v1328_v54, %v1327_v52  ;;  %v1336_v54 = vld [vmem:[#allocation7 + $0x380] sm:$0xff] }
 0x677   : > { %2537 = vmatprep.subr.bf16.mxu1 %v2536_v5  ;;  %v2510_v37 = vpack.c.bf16 %v1308_v30, %v1307_v29  ;;  %v1357_v5 = vld [vmem:[#allocation7 + $0x428] sm:$0xff]  ;;  %v1344_v29 = vld [vmem:[#allocation7 + $0x3c0] sm:$0xff]  ;;  %v1335_v52 = vld [vmem:[#allocation7 + $0x378] sm:$0xff] }
 0x678   : > { %v2544_v17 = vpack.c.bf16 %v1358_v7, %v1357_v5  ;;  %v1366_v5 = vld [vmem:[#allocation7 + $0x470] sm:$0xff] }
 0x679   : > { %2467 = vmatpush3.bf16.msra.mxu0 %v2466_v32  ;;  %v846_v32 = vrot.slane %v3085_v8, %v845_v22 }
 0x67a   : > { %2469 = vmatprep.subr.bf16.mxu0 %v2468_v39  ;;  %v1338_v39 = vld [vmem:[#allocation7 + $0x390] sm:$0xff] }
 0x67d   : > { %2471 = vmatpush3.bf16.msra.mxu0 %v2470_v44  ;;  %v1309_v44 = vld [vmem:[#allocation7 + $0x2a8] sm:$0xff] }
 0x67e   : > { %2505 = vmatprep.subr.bf16.mxu0 %v2504_v57  ;;  %v2538_v57 = vpack.c.bf16 %v1338_v39, %v1337_v38  ;;  %v2514_v58 = vpack.c.bf16 %v1310_v45, %v1309_v44  ;;  %v1334_v38 = vld [vmem:[#allocation7 + $0x370] sm:$0xff] }
 0x723   : > { %v945_v12 = vpop.f32.mrb[4].mxu0  ;;  %v3093_v13 = vpop.f32.mrb[6].mxu1 }
 0x724   : > { %v946_v14 = vadd.f32 %v945_v12, %v834_v10  ;;  %v947_v15 = vpop.f32.mrb[5].mxu0  ;;  %v1089_v16 = vpop.f32.mrb[7].mxu1  ;;  %v1330_v10 = vld [vmem:[#allocation7 + $0x350] sm:$0xff]  ;;  %v2518_v12 = vpack.c.bf16 %v1312_v4, %v1311_v3  ;;  %v1320_v3 = vld [vmem:[#allocation7 + $0x300] sm:$0xff]  ;;  %v1365_v4 = vld [vmem:[#allocation7 + $0x468] sm:$0xff] }
 0x725   : > { %v948_v20 = vadd.f32 %v947_v15, %v838_v63  ;;  %v1090_v21 = vadd.f32 %v1089_v16, %v854_v11  ;;  %v2542_v11 = vpack.c.bf16 %v1340_v60, %v1339_v59  ;;  %v1342_v15 = vld [vmem:[#allocation7 + $0x3b0] sm:$0xff]  ;;  %v2520_v18 = vpack.c.bf16 %v1330_v10, %v1329_v9 }
 0x726   : > { %v1233_v26 = vmax.f32 %v946_v14, 0.0  ;;  %v1341_v14 = vld [vmem:[#allocation7 + $0x3a8] sm:$0xff]  ;;  %v2556_v60 = vpack.c.bf16 %v1364_v51, %v1363_v50  ;;  %v857_v10 = vsub.s32 6, %v3036_v46  ;;  %v1947_v50 = vld [vmem:[#allocation7] ss:$0 sm:$0xff] }
 0x727   : > { %v1234_v25 = vmax.f32 %v948_v20, 0.0  ;;  %v1238_v31 = vmax.f32 %v1090_v21, 0.0  ;;  %v1314_v20 = vld [vmem:[#allocation7 + $0x2d0] sm:$0xff]  ;;  %v1359_v21 = vld [vmem:[#allocation7 + $0x438] sm:$0xff] }
 0x728   : > { %v2548_v30 = vpack.c.bf16 %v1360_v23, %v1359_v21  ;;  %v1351_v21 = vld [vmem:[#allocation7 + $0x3f8] sm:$0xff] }
 0x729   : > { %1438 = vmatprep.mubr.f32.mxu0 %v1234_v25  ;;  %v1332_v25 = vld [vmem:[#allocation7 + $0x360] sm:$0xff] }
 0x72a   : > { %1439 = vmatmul.mubr.f32.vlgmr.msra.gmra.mrb[10].mxu0 %v1233_v26  ;;  %v2546_v26 = vpack.c.bf16 %v1342_v15, %v1341_v14  ;;  %v1350_v14 = vld [vmem:[#allocation7 + $0x3f0] sm:$0xff]  ;;  %v1367_v15 = vld [vmem:[#allocation7 + $0x478] sm:$0xff] }
 0x72b   : > { %v1016_v35 = vpop.f32.mrb[6].mxu0  ;;  %v3099_v36 = vpop.f32.mrb[8].mxu1  ;;  %2507 = vmatpush3.bf16.msra.mxu0 %v2506_v56  ;;  %1578 = vmatprep.mubr.f32.mxu0 %v1238_v31  ;;  %v2524_v31 = vpack.c.bf16 %v1332_v25, %v1331_v24  ;;  %v1656_v24 = vld [vmem:[#allocation7 + $0x10] sm:$0xff]  ;;  %v1657_v25 = vld [vmem:[#allocation7 + $0x18] sm:$0xff] }
 0x72c   : > { %v1017_v40 = vadd.f32 %v1016_v35, %v842_v27  ;;  %v1018_v41 = vpop.f32.mrb[7].mxu0  ;;  %v2261_v42 = vpop.f32.mrb[9].mxu1  ;;  %2509 = vmatprep.subr.bf16.mxu0 %v2508_v28  ;;  %v2522_v27 = vpack.c.bf16 %v1314_v20, %v1313_v19  ;;  %v1343_v28 = vld [vmem:[#allocation7 + $0x3b8] sm:$0xff]  ;;  %v1362_v35 = vld [vmem:[#allocation7 + $0x450] sm:$0xff]  ;;  %v858_v19 = vrot.slane %v3085_v8, %v857_v10 }
 0x72d   : > { %v1019_v49 = vadd.f32 %v1018_v41, %v846_v32  ;;  %v1315_v32 = vld [vmem:[#allocation7 + $0x2d8] sm:$0xff]  ;;  %v2550_v39 = vpack.c.bf16 %v1344_v29, %v1343_v28  ;;  %v1345_v41 = vld [vmem:[#allocation7 + $0x3c8] sm:$0xff]  ;;  %v1346_v42 = vld [vmem:[#allocation7 + $0x3d0] sm:$0xff]  ;;  %v2552_v44 = vpack.c.bf16 %v1362_v35, %v1361_v34 }
 0x72e   : > { %v1235_v61 = vmax.f32 %v1017_v40, 0.0  ;;  %v2526_v40 = vpack.c.bf16 %v1316_v33, %v1315_v32  ;;  %v1660_v28 = vld [vmem:[#allocation7 + $0x30] sm:$0xff]  ;;  %v1663_v32 = vld [vmem:[#allocation7 + $0x48] sm:$0xff]  ;;  %v1665_v35 = vld [vmem:[#allocation7 + $0x58] sm:$0xff] }
 0x72f   : > { %v1236_v55 = vmax.f32 %v1019_v49, 0.0  ;;  %2511 = vmatpush3.bf16.msra.mxu0 %v2510_v37  ;;  %v1333_v37 = vld [vmem:[#allocation7 + $0x368] sm:$0xff]  ;;  %v1318_v49 = vld [vmem:[#allocation7 + $0x2f0] sm:$0xff] }
 0x730   : > { %2513 = vmatprep.subr.bf16.mxu0 %v2512_v43  ;;  %v849_v43 = vsub.s32 4, %v3036_v46  ;;  %v2528_v45 = vpack.c.bf16 %v1334_v38, %v1333_v37  ;;  %v1664_v33 = vld [vmem:[#allocation7 + $0x50] sm:$0xff]  ;;  %v1666_v37 = vld [vmem:[#allocation7 + $0x60] sm:$0xff] }
 0x731   : > { %1508 = vmatprep.mubr.f32.mxu1 %v1236_v55  ;;  %v2554_v55 = vpack.c.bf16 %v1346_v42, %v1345_v41  ;;  %v2581_v34 = vpack.c.bf16 %v1664_v33, %v1663_v32  ;;  %v2584_v38 = vpack.c.bf16 %v1666_v37, %v1665_v35  ;;  %v1669_v42 = vld [vmem:[#allocation7 + $0x78] sm:$0xff] }
 0x732   : > { %1509 = vmatmul.mubr.f32.vlgmr.msra.gmra.mrb[10].mxu1 %v1235_v61  ;;  %v850_v59 = vrot.slane %v3085_v8, %v849_v43  ;;  %v2532_v61 = vpack.c.bf16 %v1336_v54, %v1335_v52  ;;  %v1655_v8 = vld [vmem:[#allocation7 + $0x8] sm:$0xff]  ;;  %v1670_v43 = vld [vmem:[#allocation7 + $0x80] sm:$0xff] }
 0x733   : > { %2539 = vmatpush3.bf16.msra.mxu1 %v2538_v57  ;;  %v3103_v63 = vpop.f32.mrb[8].mxu0  ;;  %2515 = vmatpush3.bf16.msra.mxu0 %v2514_v58  ;;  %v2530_v57 = vpack.c.bf16 %v1318_v49, %v1317_v48  ;;  %v1347_v58 = vld [vmem:[#allocation7 + $0x3d8] sm:$0xff] }
 0x734   : > { %v1160_v16 = vpop.f32.mrb[9].mxu0  ;;  %2541 = vmatprep.subr.bf16.mxu1 %v2540_v62  ;;  %2517 = vmatprep.subr.bf16.mxu0 %v2516_v2  ;;  %v1348_v62 = vld [vmem:[#allocation7 + $0x3e0] sm:$0xff]  ;;  %v1319_v2 = vld [vmem:[#allocation7 + $0x2f8] sm:$0xff]  ;;  %v1088_v9 = vadd.f32 %v3093_v13, %v850_v59  ;;  %v1159_v13 = vadd.f32 %v3103_v63, %v858_v19  ;;  %v1659_v63 = vld [vmem:[#allocation7 + $0x28] sm:$0xff] }
 0x735   : > { %v1161_v22 = vadd.f32 %v1160_v16, %v862_v6  ;;  %v2558_v6 = vpack.c.bf16 %v1348_v62, %v1347_v58  ;;  %v2534_v7 = vpack.c.bf16 %v1320_v3, %v1319_v2  ;;  %v1368_v16 = vld [vmem:[#allocation7 + $0x480] sm:$0xff]  ;;  %v2575_v29 = vpack.c.bf16 %v1660_v28, %v1659_v63  ;;  %v828_v62 = vld [vmem:[#allocation6 + $0x40] ss:$8 sm:$0x1] }
 0x736   : > { %v2564_v20 = vpack.c.bf16 %v1368_v16, %v1367_v15  ;;  %v1239_v23 = vmax.f32 %v1159_v13, 0.0  ;;  %v866_v2 = vrot.slane %v828_v62, %v3039_v47  ;;  %v1948_v47 = vld [vmem:[#allocation7 + $0x1] ss:$0 sm:$0xff]  ;;  %v1949_v19 = vld [vmem:[#allocation7 + $0x2] ss:$0 sm:$0xff] }
 0x737   : > { %v1240_v56 = vmax.f32 %v1161_v22, 0.0  ;;  %2543 = vmatpush3.bf16.msra.mxu1 %v2542_v11  ;;  %2519 = vmatpush3.bf16.msra.mxu0 %v2518_v12  ;;  %v2560_v11 = vpack.c.bf16 %v1366_v5, %v1365_v4  ;;  %v1349_v12 = vld [vmem:[#allocation7 + $0x3e8] sm:$0xff]  ;;  %v1352_v22 = vld [vmem:[#allocation7 + $0x400] sm:$0xff] }
 0x738   : > { %2545 = vmatprep.subr.bf16.mxu1 %v2544_v17  ;;  %2521 = vmatprep.subr.bf16.mxu0 %v2520_v18  ;;  %v2562_v17 = vpack.c.bf16 %v1350_v14, %v1349_v12  ;;  %v1237_v18 = vmax.f32 %v1088_v9, 0.0  ;;  %v2566_v46 = vpack.c.bf16 %v1352_v22, %v1351_v21  ;;  %v1230_v5 = vadd.f32 %v3099_v36, %v866_v2  ;;  %v1938_v36 = vld [vmem:[%s3146_s1] ss:$0 sm:$0xff] }
 0x739   : > { %1648 = vmatprep.mubr.f32.mxu1 %v1240_v56  ;;  %v2569_v56 = vpack.c.bf16 %v1656_v24, %v1655_v8  ;;  %v387_v21 = vadd.f32 %v1938_v36, %v3042_v53 }
 0x73b   : > { %2547 = vmatpush3.bf16.msra.mxu1 %v2546_v26  ;;  %2523 = vmatpush3.bf16.msra.mxu0 %v2522_v27  ;;  %v1658_v26 = vld [vmem:[#allocation7 + $0x20] sm:$0xff] }
 0x73c   : > { %2549 = vmatprep.subr.bf16.mxu1 %v2548_v30  ;;  %2525 = vmatprep.subr.bf16.mxu0 %v2524_v31  ;;  %v2572_v27 = vpack.c.bf16 %v1658_v26, %v1657_v25  ;;  %v1662_v30 = vld [vmem:[#allocation7 + $0x40] sm:$0xff] }
 0x73f   : > { %2551 = vmatpush3.bf16.msra.mxu1 %v2550_v39  ;;  %2527 = vmatpush3.bf16.msra.mxu0 %v2526_v40  ;;  %v1667_v39 = vld [vmem:[#allocation7 + $0x68] sm:$0xff]  ;;  %v1668_v40 = vld [vmem:[#allocation7 + $0x70] sm:$0xff] }
 0x740   : > { %2553 = vmatprep.subr.bf16.mxu1 %v2552_v44  ;;  %2529 = vmatprep.subr.bf16.mxu0 %v2528_v45  ;;  %v2587_v41 = vpack.c.bf16 %v1668_v40, %v1667_v39  ;;  %v2590_v44 = vpack.c.bf16 %v1670_v43, %v1669_v42 }
 0x743   : > { %2555 = vmatpush3.bf16.msra.mxu1 %v2554_v55  ;;  %2531 = vmatpush3.bf16.msra.mxu0 %v2530_v57 }
 0x744   : > { %2557 = vmatprep.subr.bf16.mxu1 %v2556_v60  ;;  %2533 = vmatprep.subr.bf16.mxu0 %v2532_v61 }
 0x747   : > { %2559 = vmatpush3.bf16.msra.mxu1 %v2558_v6  ;;  %2535 = vmatpush3.bf16.msra.mxu0 %v2534_v7 }
 0x748   : > { %2561 = vmatprep.subr.bf16.mxu1 %v2560_v11  ;;  %2568 = vmatprep.subr.bf16.mxu0 %v2823_v1 }
 0x74a   : > { %1579 = vmatmul.mubr.f32.vlgmr.msra.gmra.mrb[12].mxu0 %v1237_v18 }
 0x74b   : > { %2563 = vmatpush3.bf16.msra.mxu1 %v2562_v17  ;;  %2294 = vmatprep.mubr.msk.f32.mxu0 %vm2824_vm0, %v2822_v0 }
 0x74c   : > { %2565 = vmatprep.subr.bf16.mxu1 %v2564_v20  ;;  %2570 = vmatpush3.bf16.msra.mxu0 %v2569_v56 }
 0x74d   : > { %2571 = vmatprep.subr.bf16.mxu0 %v2823_v1 }
 0x74f   : > { %2567 = vmatpush3.bf16.msra.mxu1 %v2566_v46 }
 0x750   : > { %2592 = vmatprep.subr.bf16.mxu1 %v2823_v1  ;;  %2573 = vmatpush3.bf16.msra.mxu0 %v2572_v27 }
 0x751   : > { %2574 = vmatprep.subr.bf16.mxu0 %v2823_v1 }
 0x752   : > { %1649 = vmatmul.mubr.f32.vlgmr.msra.gmra.mrb[12].mxu1 %v1239_v23 }
 0x753   : > { %2329 = vmatprep.mubr.msk.f32.mxu1 %vm2824_vm0, %v2822_v0  ;;  %2594 = vmatpush3.bf16.msra.mxu1 %v2569_v56  ;;  %v1661_v0 = vld [vmem:[#allocation7 + $0x38] sm:$0xff] }
 0x754   : > { %2595 = vmatprep.subr.bf16.mxu1 %v2823_v1  ;;  %2576 = vmatpush3.bf16.msra.mxu0 %v2575_v29  ;;  %v2578_v31 = vpack.c.bf16 %v1662_v30, %v1661_v0 }
 0x755   : > { %2577 = vmatprep.subr.bf16.mxu0 %v2823_v1 }
 0x757   : > { %2597 = vmatpush3.bf16.msra.mxu1 %v2572_v27 }
 0x758   : > { %2598 = vmatprep.subr.bf16.mxu1 %v2823_v1  ;;  %2579 = vmatpush3.bf16.msra.mxu0 %v2578_v31 }
 0x759   : > { %2580 = vmatprep.subr.bf16.mxu0 %v2823_v1 }
 0x75b   : > { %2600 = vmatpush3.bf16.msra.mxu1 %v2575_v29 }
 0x75c   : > { %2601 = vmatprep.subr.bf16.mxu1 %v2823_v1  ;;  %2582 = vmatpush3.bf16.msra.mxu0 %v2581_v34 }
 0x75d   : > { %2583 = vmatprep.subr.bf16.mxu0 %v2823_v1 }
 0x75f   : > { %2603 = vmatpush3.bf16.msra.mxu1 %v2578_v31 }
 0x760   : > { %2604 = vmatprep.subr.bf16.mxu1 %v2823_v1  ;;  %2585 = vmatpush3.bf16.msra.mxu0 %v2584_v38 }
 0x761   : > { %2586 = vmatprep.subr.bf16.mxu0 %v2823_v1 }
 0x763   : > { %2606 = vmatpush3.bf16.msra.mxu1 %v2581_v34 }
 0x764   : > { %2607 = vmatprep.subr.bf16.mxu1 %v2823_v1  ;;  %2588 = vmatpush3.bf16.msra.mxu0 %v2587_v41 }
 0x765   : > { %2589 = vmatprep.subr.bf16.mxu0 %v2823_v1 }
 0x767   : > { %2609 = vmatpush3.bf16.msra.mxu1 %v2584_v38 }
 0x768   : > { %2610 = vmatprep.subr.bf16.mxu1 %v2823_v1  ;;  %2591 = vmatpush3.bf16.msra.mxu0 %v2590_v44 }
 0x76b   : > { %2612 = vmatpush3.bf16.msra.mxu1 %v2587_v41 }
 0x76c   : > { %2613 = vmatprep.subr.bf16.mxu1 %v2823_v1 }
 0x76f   : > { %2615 = vmatpush3.bf16.msra.mxu1 %v2590_v44 }
 0x7fd   : > { %v2028_v45 = vpop.f32.mrb[10].mxu0 }
 0x7fe   : > { %v2029_v48 = vpop.f32.mrb[11].mxu0 }
 0x7ff   : > { %v2030_v49 = vadd.f32 %v2029_v48, %v2028_v45 }
 0x801   : > { %v1441_v54 = vadd.f32 %v2030_v49, %v1947_v50 }
 0x805   : > { %v2063_v51 = vpop.f32.mrb[10].mxu1 }
 0x806   : > { %v2064_v52 = vpop.f32.mrb[11].mxu1 }
 0x807   : > { %v2065_v55 = vadd.f32 %v2064_v52, %v2063_v51 }
 0x809   : > { %v1511_v57 = vadd.f32 %v2065_v55, %v1441_v54 }
 0x81d   : > { %v2098_v58 = vpop.f32.mrb[12].mxu0 }
 0x81e   : > { %v2099_v59 = vpop.f32.mrb[13].mxu0 }
 0x81f   : > { %v2100_v60 = vadd.f32 %v2099_v59, %v2098_v58 }
 0x821   : > { %v1581_v61 = vadd.f32 %v2100_v60, %v1511_v57 }
 0x825   : > { %v2133_v1 = vpop.f32.mrb[12].mxu1 }
 0x826   : > { %v2134_v3 = vpop.f32.mrb[13].mxu1 }
 0x827   : > { %v2135_v4 = vadd.f32 %v2134_v3, %v2133_v1 }
 0x829   : > { %v1651_v6 = vadd.f32 %v2135_v4, %v1581_v61 }
 0x82b   : > { %v1654_v7 = vadd.f32 %v1651_v6, %v1230_v5 }
 0x82d   : > { %2295 = vmatmul.mubr.f32.vlgmr.msra.gmra.mrb[14].mxu0 %v1654_v7 }
 0x900   : > { %v1737_v9 = vpop.f32.mrb[14].mxu0 }
 0x901   : > { %v1741_v10 = vsub.f32 %v1654_v7, %v1737_v9  ;;  %v2296_v11 = vpop.f32.mrb[15].mxu0 }
 0x903   : > { %v1742_v12 = vmul.f32 %v1741_v10, %v1741_v10 }
 0x905   : > { %2330 = vmatmul.mubr.f32.vlgmr.msra.gmra.mrb[14].mxu1 %v1742_v12 }
 0x9d8   : > { %v1809_v14 = vpop.f32.mrb[14].mxu1 }
 0x9d9   : > { %v1810_v15 = vadd.f32 1e-05, %v1809_v14  ;;  %v2331_v16 = vpop.f32.mrb[15].mxu1 }
 0x9db   : > { %2678 = vrsqrt.f32 %v1810_v15 }
 0x9e5   : > { %v2679_v17 = vpop.eup %2678 }
 0x9e6   : > { %v1814_v18 = vmul.f32 %v2679_v17, %v1741_v10 }
 0x9e8   : > { %v1820_v20 = vmul.f32 %v1948_v47, %v1814_v18 }
 0x9ea   : > { %v1826_v22 = vadd.f32 %v1949_v19, %v1820_v20 }
 0x9ec   : > { %v1827_v46 = vadd.f32 %v1826_v22, %v387_v21 }
 0x9ee   : > { %1828 = vst [vmem:[%s305_s15] sm:$0xff] %v1827_v46 }
 0x9ef PF: > { %s19_s21 = sadd.s32 1, %s2810_s21  }
 0x9f0   : > { %p16_p6 = scmp.ge.s32.totalorder %s19_s21, 4  }
 0x9f2   :  { %18 = sbr.rel (!%p16_p6) target bundleno = 3 (0x3), region = 92 }
 0x9f9   :  { %1848 = vsyncpa [#allocation3], 1 }
 0x9fa   :  { %1850 = vsyncpa [#allocation3 + $0x1], 1 }
 0x9fb   :  { %1851 = vsyncpa [#allocation5], 1 }
 0x9fc   :  { %1852 = vsyncpa [#allocation8], 1 }

</bundles_post_ra>
